<compile_context>
chip_gen: v7x
topology: tpu7x:2x2x1
jax: 0.10.0
libtpu: 0.0.40
codegen_flags: <defaults>
</compile_context>

<pallas_src>
import functools
import inspect

import numpy as np

import jax
import jax.numpy as jnp
from jax.experimental import pallas as pl
from jax.experimental.pallas import tpu as pltpu


_LANE = 128
_SMALL_PATH_BYTES = 24 * 1024 * 1024    # whole-problem-in-VMEM fast-path budget
_X_RESIDENT_BYTES = 32 * 1024 * 1024    # resident aggregation-input budget
_VMEM_LIMIT_BYTES = 48 * 1024 * 1024    # safe on v5e/v6e (128 MiB) and v7x (64 MiB)

_HAS_PIPELINE_MODE = (
    hasattr(pl, "Buffered")
    and "pipeline_mode" in inspect.signature(pl.BlockSpec).parameters
)


def _round_up(v, m):
    return (v + m - 1) // m * m


def _pad2(arr, rows, cols):
    r, c = arr.shape
    return jnp.pad(arr, ((0, rows - r), (0, cols - c)))


def _spec(block_shape, index_map, buffers=None):
    """BlockSpec with optional deeper pipelining (skipped if API lacks it)."""
    if buffers is not None and _HAS_PIPELINE_MODE:
        return pl.BlockSpec(block_shape, index_map,
                            pipeline_mode=pl.Buffered(buffers))
    return pl.BlockSpec(block_shape, index_map)


# --------------------------------------------------------------------------
# Small-problem fast path: one grid-less call per layer, everything in VMEM.
# --------------------------------------------------------------------------
def _sage_small_kernel(a_ref, x_ref, w_ref, b_ref, o_ref, *, apply_relu):
    agg = jnp.dot(a_ref[...], x_ref[...], preferred_element_type=jnp.float32)
    cat = jnp.concatenate([agg.astype(jnp.bfloat16), x_ref[...]], axis=-1)
    out = (jnp.dot(cat, w_ref[...], preferred_element_type=jnp.float32)
           + b_ref[...].astype(jnp.float32))
    if apply_relu:
        out = jnp.maximum(out, 0.0)
    o_ref[...] = out.astype(o_ref.dtype)


def _sage_layer_small(a, x, w, b, *, apply_relu, out_dtype):
    n_pad = a.shape[0]
    h_pad = w.shape[1]
    return pl.pallas_call(
        functools.partial(_sage_small_kernel, apply_relu=apply_relu),
        out_shape=jax.ShapeDtypeStruct((n_pad, h_pad), out_dtype),
        compiler_params=pltpu.CompilerParams(
            vmem_limit_bytes=_VMEM_LIMIT_BYTES),
    )(a, x, w, b)


# --------------------------------------------------------------------------
# Tiled block-CSR path.
# --------------------------------------------------------------------------
def _sage_tiled_kernel_resident(cnt_ref, idx_ref, a_ref, x_ref, w_ref, b_ref,
                                o_ref, acc_ref, *, apply_relu, tm, tk, max_nb):
    i = pl.program_id(0)          # output-row tile
    k = pl.program_id(1)          # position in this row tile's nonzero-block list

    @pl.when(k == 0)
    def _():
        acc_ref[...] = jnp.zeros_like(acc_ref)

    # Only nonzero adjacency blocks appear in the compacted list; padding
    # entries repeat the last valid block index (same block -> no extra DMA)
    # and are masked out of the accumulate here.
    @pl.when(k < cnt_ref[i])
    def _():
        kb = idx_ref[i * max_nb + k]
        xk = x_ref[pl.ds(pl.multiple_of(kb * tk, tk), tk), :]
        acc_ref[...] += jnp.dot(a_ref[...], xk,
                                preferred_element_type=jnp.float32)

    @pl.when(k == pl.num_programs(1) - 1)
    def _():
        xi = x_ref[pl.ds(pl.multiple_of(i * tm, tm), tm), :]
        cat = jnp.concatenate([acc_ref[...].astype(jnp.bfloat16), xi], axis=-1)
        out = (jnp.dot(cat, w_ref[...], preferred_element_type=jnp.float32)
               + b_ref[...].astype(jnp.float32))
        if apply_relu:
            out = jnp.maximum(out, 0.0)
        o_ref[...] = out.astype(o_ref.dtype)


def _sage_tiled_kernel_streamed(cnt_ref, idx_ref, a_ref, xk_ref, xi_ref, w_ref,
                                b_ref, o_ref, acc_ref, *, apply_relu):
    i = pl.program_id(0)
    k = pl.program_id(1)

    @pl.when(k == 0)
    def _():
        acc_ref[...] = jnp.zeros_like(acc_ref)

    @pl.when(k < cnt_ref[i])
    def _():
        acc_ref[...] += jnp.dot(a_ref[...], xk_ref[...],
                                preferred_element_type=jnp.float32)

    @pl.when(k == pl.num_programs(1) - 1)
    def _():
        cat = jnp.concatenate(
            [acc_ref[...].astype(jnp.bfloat16), xi_ref[...]], axis=-1)
        out = (jnp.dot(cat, w_ref[...], preferred_element_type=jnp.float32)
               + b_ref[...].astype(jnp.float32))
        if apply_relu:
            out = jnp.maximum(out, 0.0)
        o_ref[...] = out.astype(o_ref.dtype)


def _sage_layer_tiled(cnt, idx, a, x, w, b, *, apply_relu, out_dtype,
                      tm, tk, max_nb, x_resident):
    n_pad = a.shape[0]
    c_pad = x.shape[1]
    h_pad = w.shape[1]
    num_m = n_pad // tm

    # A tiles fetched through the compacted nonzero-block list: zero adjacency
    # blocks never generate a grid step, so their DMA is skipped entirely.
    a_spec = _spec((tm, tk),
                   lambda i, k, cnt_r, idx_r, _m=max_nb: (i, idx_r[i * _m + k]),
                   buffers=3)
    w_spec = pl.BlockSpec((2 * c_pad, h_pad), lambda i, k, c, d: (0, 0))
    b_spec = pl.BlockSpec((1, h_pad), lambda i, k, c, d: (0, 0))
    out_spec = pl.BlockSpec((tm, h_pad), lambda i, k, c, d: (i, 0))

    if x_resident:
        kernel = functools.partial(_sage_tiled_kernel_resident,
                                   apply_relu=apply_relu, tm=tm, tk=tk,
                                   max_nb=max_nb)
        in_specs = [a_spec,
                    pl.BlockSpec((n_pad, c_pad), lambda i, k, c, d: (0, 0)),
                    w_spec, b_spec]
        args = (cnt, idx, a, x, w, b)
    else:
        kernel = functools.partial(_sage_tiled_kernel_streamed,
                                   apply_relu=apply_relu)
        xk_spec = _spec(
            (tk, c_pad),
            lambda i, k, cnt_r, idx_r, _m=max_nb: (idx_r[i * _m + k], 0),
            buffers=3)
        xi_spec = pl.BlockSpec((tm, c_pad), lambda i, k, c, d: (i, 0))
        in_specs = [a_spec, xk_spec, xi_spec, w_spec, b_spec]
        args = (cnt, idx, a, x, x, w, b)

    grid_spec = pltpu.PrefetchScalarGridSpec(
        num_scalar_prefetch=2,                       # cnt, idx -> SMEM
        grid=(num_m, max_nb),
        in_specs=in_specs,
        out_specs=out_spec,
        scratch_shapes=[pltpu.VMEM((tm, c_pad), jnp.float32)],
    )
    return pl.pallas_call(
        kernel,
        out_shape=jax.ShapeDtypeStruct((n_pad, h_pad), out_dtype),
        grid_spec=grid_spec,
        compiler_params=pltpu.CompilerParams(
            dimension_semantics=("parallel", "arbitrary"),
            vmem_limit_bytes=_VMEM_LIMIT_BYTES),
    )(*args)


# --------------------------------------------------------------------------
# Jitted 2-layer forwards.
# --------------------------------------------------------------------------
@functools.partial(jax.jit, static_argnames=("n_pad", "c_pad", "h_pad"))
def _gnn_small(a, x, wl1, wr1, b1, wl2, wr2, b2, *, n_pad, c_pad, h_pad):
    bf = jnp.bfloat16
    a_p = _pad2(a, n_pad, n_pad).astype(bf)
    x_p = _pad2(x, n_pad, c_pad).astype(bf)
    w1 = jnp.concatenate(
        [_pad2(wl1, c_pad, h_pad), _pad2(wr1, c_pad, h_pad)], axis=0).astype(bf)
    w2 = jnp.concatenate(
        [_pad2(wl2, h_pad, h_pad), _pad2(wr2, h_pad, h_pad)], axis=0).astype(bf)
    b1p = _pad2(b1, 1, h_pad)
    b2p = _pad2(b2, 1, h_pad)
    h = _sage_layer_small(a_p, x_p, w1, b1p, apply_relu=True, out_dtype=bf)
    return _sage_layer_small(a_p, h, w2, b2p, apply_relu=False,
                             out_dtype=jnp.float32)


@functools.partial(jax.jit,
                   static_argnames=("n_pad", "c_pad", "h_pad", "tm", "tk",
                                    "max_nb", "x_resident"))
def _gnn_tiled(cnt, idx, a, x, wl1, wr1, b1, wl2, wr2, b2, *,
               n_pad, c_pad, h_pad, tm, tk, max_nb, x_resident):
    bf = jnp.bfloat16
    a_p = _pad2(a, n_pad, n_pad).astype(bf)
    x_p = _pad2(x, n_pad, c_pad).astype(bf)
    w1 = jnp.concatenate(
        [_pad2(wl1, c_pad, h_pad), _pad2(wr1, c_pad, h_pad)], axis=0).astype(bf)
    w2 = jnp.concatenate(
        [_pad2(wl2, h_pad, h_pad), _pad2(wr2, h_pad, h_pad)], axis=0).astype(bf)
    b1p = _pad2(b1, 1, h_pad)
    b2p = _pad2(b2, 1, h_pad)
    # Layer-1 output stays bf16 + lane-dense: it is layer 2's input.
    h = _sage_layer_tiled(cnt, idx, a_p, x_p, w1, b1p, apply_relu=True,
                          out_dtype=bf, tm=tm, tk=tk, max_nb=max_nb,
                          x_resident=x_resident)
    return _sage_layer_tiled(cnt, idx, a_p, h, w2, b2p, apply_relu=False,
                             out_dtype=jnp.float32, tm=tm, tk=tk,
                             max_nb=max_nb, x_resident=x_resident)


# --------------------------------------------------------------------------
# Graph preprocessing (structure only; O(E), no dense-A pass).
# --------------------------------------------------------------------------
def build_normalized_adjacency(edge_index, num_nodes):
    """A[i, j] = 1/deg_in(i) for edge j->i (edge_index rows = [src; dst])."""
    src, dst = edge_index[0], edge_index[1]
    adj = jnp.zeros((num_nodes, num_nodes), jnp.float32)
    adj = adj.at[dst, src].add(1.0)
    deg = jnp.maximum(jnp.sum(adj, axis=1, keepdims=True), 1.0)  # isolated -> 0
    return adj / deg


def _build_block_csr(edge_index, n_pad, tm, tk):
    """Per row tile: count + compacted list of nonzero adjacency k-blocks.

    Built O(E) directly from edge_index (never reads the dense A). Returned as
    1-D int32 arrays (2-D SMEM pads to [ceil(R/8)*8, ceil(C/128)*128])."""
    src = np.asarray(edge_index[0]).astype(np.int64)
    dst = np.asarray(edge_index[1]).astype(np.int64)
    num_m = n_pad // tm
    num_k = n_pad // tk
    keys = np.unique(dst // tm * num_k + src // tk)
    ubi = (keys // num_k).astype(np.int32)
    ubk = (keys % num_k).astype(np.int32)
    cnt = np.zeros((num_m,), np.int32)
    np.add.at(cnt, ubi, 1)
    max_nb = max(int(cnt.max()) if cnt.size else 0, 1)
    idx = np.zeros((num_m, max_nb), np.int32)
    for r in range(num_m):
        ks = ubk[ubi == r]
        if ks.size:
            idx[r, :ks.size] = ks
            idx[r, ks.size:] = ks[-1]   # repeat last block: Pallas skips re-DMA
    return jnp.asarray(cnt), jnp.asarray(idx.reshape(-1)), max_nb


def gnn_forward(x, edge_index, params, *, force_tiled=False, tile=None,
                force_streaming=False):
    """2-layer GraphSAGE forward matching the PyTorch GNN module."""
    wl1, wr1, b1, wl2, wr2, b2 = params
    n = x.shape[0]
    hid = wl1.shape[1]
    c_pad = _round_up(x.shape[1], _LANE)
    h_pad = _round_up(hid, _LANE)

    a = build_normalized_adjacency(edge_index, n)

    # Small-problem fast path: everything VMEM resident, grid-less calls.
    n_small = _round_up(n, _LANE)
    w_pad = max(c_pad, h_pad)
    small_bytes = (2 * (n_small * n_small + 2 * n_small * w_pad
                        + 2 * 2 * w_pad * h_pad) + 4 * n_small * h_pad)
    if not force_tiled and 2 * small_bytes <= _SMALL_PATH_BYTES:
        out = _gnn_small(a, x, wl1, wr1, b1, wl2, wr2, b2,
                         n_pad=n_small, c_pad=c_pad, h_pad=h_pad)
        return out[:n, :hid]

    # Tiled block-CSR path.
    tm = tk = int(tile) if tile is not None else (256 if n >= 512 else 128)
    n_pad = _round_up(n, tm)
    if (n_pad // tm) % 2:   # even row-tile count: balances v7x's 2 TensorCores
        n_pad += tm
    cnt, idx, max_nb = _build_block_csr(edge_index, n_pad, tm, tk)
    x_resident = (not force_streaming
                  and 2 * n_pad * max(c_pad, h_pad) * 2 <= _X_RESIDENT_BYTES)
    out = _gnn_tiled(cnt, idx, a, x, wl1, wr1, b1, wl2, wr2, b2,
                     n_pad=n_pad, c_pad=c_pad, h_pad=h_pad, tm=tm, tk=tk,
                     max_nb=max_nb, x_resident=x_resident)
    return out[:n, :hid]


# --------------------------------------------------------------------------
# Pure-JAX references.
# --------------------------------------------------------------------------
def reference_forward_bf16(a, x, wl1, wr1, b1, wl2, wr2, b2):
    """Same bf16-input / f32-accumulate arithmetic as the kernels."""
    bf = jnp.bfloat16

    def layer(adj, xin, wl, wr, b, relu):
        agg = jnp.dot(adj.astype(bf), xin.astype(bf),
                      preferred_element_type=jnp.float32)
        out = (jnp.dot(agg.astype(bf), wl.astype(bf),
                       preferred_element_type=jnp.float32)
               + jnp.dot(xin.astype(bf), wr.astype(bf),
                         preferred_element_type=jnp.float32)
               + b)
        return jnp.maximum(out, 0.0) if relu else out

    h = layer(a, x, wl1, wr1, b1, True).astype(bf)
    return layer(a, h, wl2, wr2, b2, False)


def reference_forward_f32(a, x, wl1, wr1, b1, wl2, wr2, b2):
    h = jnp.maximum(a @ x @ wl1 + x @ wr1 + b1, 0.0)
    return a @ h @ wl2 + h @ wr2 + b2


if __name__ == "__main__":
    num_nodes = 300
    in_channels = 16
    hidden_channels = 32
    num_edges = 1200

    key = jax.random.PRNGKey(0)
    k_x, k_src, k_dst, k1, k2, k3, k4, k5, k6 = jax.random.split(key, 9)

    # Node features (replaces the CSV-derived literal features).
    x = jax.random.normal(k_x, (num_nodes, in_channels), jnp.float32)

    # Deterministic synthetic edge_index (2, E): row0 = src, row1 = dst.
    # TODO(synk): the original script builds edge_index from author_author.csv
    # via pandas; file I/O is replaced by this synthetic graph.
    src = jax.random.randint(k_src, (num_edges,), 0, num_nodes)
    dst = jax.random.randint(k_dst, (num_edges,), 0, num_nodes)
    edge_index = jnp.stack([src, dst], axis=0)

    # SAGEConv parameters (lin_l: neighbor/aggregation path with bias, lin_r: root).
    s1 = 1.0 / jnp.sqrt(in_channels)
    s2 = 1.0 / jnp.sqrt(hidden_channels)
    wl1 = jax.random.uniform(k1, (in_channels, hidden_channels), jnp.float32, -s1, s1)
    wr1 = jax.random.uniform(k2, (in_channels, hidden_channels), jnp.float32, -s1, s1)
    b1 = jax.random.uniform(k3, (1, hidden_channels), jnp.float32, -s1, s1)
    wl2 = jax.random.uniform(k4, (hidden_channels, hidden_channels), jnp.float32, -s2, s2)
    wr2 = jax.random.uniform(k5, (hidden_channels, hidden_channels), jnp.float32, -s2, s2)
    b2 = jax.random.uniform(k6, (1, hidden_channels), jnp.float32, -s2, s2)
    params = (wl1, wr1, b1, wl2, wr2, b2)

    a = build_normalized_adjacency(edge_index, num_nodes)
    ref_bf16 = reference_forward_bf16(a, x, *params)
    ref_f32 = reference_forward_f32(a, x, *params)

    # Auto path (small-problem fast path at this size) plus both tiled
    # variants (VMEM-resident x and streamed x) to exercise the block-CSR grid.
    outs = [
        jax.block_until_ready(gnn_forward(x, edge_index, params)),
        jax.block_until_ready(
            gnn_forward(x, edge_index, params, force_tiled=True, tile=128)),
        jax.block_until_ready(
            gnn_forward(x, edge_index, params, force_tiled=True, tile=128,
                        force_streaming=True)),
    ]
    for out in outs:
        assert out.shape == (num_nodes, hidden_channels)
        # Apples-to-apples vs a reference using the same bf16-input arithmetic.
        assert jnp.allclose(out, ref_bf16, atol=1e-2, rtol=1e-2)
        # Semantics preserved vs the original f32 module (bf16 quantization slack).
        assert jnp.allclose(out, ref_f32, atol=6e-2, rtol=6e-2)

    print("KERNEL_OK")
</pallas_src>

<mosaic_0001>
module attributes {stable_mosaic.version = 11 : i64} {
  func.func @_sage_small_kernel(%arg0: memref<384x384xbf16, #tpu.memory_space<vmem>>, %arg1: memref<384x128xbf16, #tpu.memory_space<vmem>>, %arg2: memref<256x128xbf16, #tpu.memory_space<vmem>>, %arg3: memref<1x128xf32, #tpu.memory_space<vmem>>, %arg4: memref<384x128xbf16, #tpu.memory_space<vmem>>) attributes {dimension_semantics = [], scalar_prefetch = 0 : i64, scratch_operands = 0 : i64, tpu.core_type = #tpu.core_type<tc>} {
    %c0 = arith.constant 0 : index
    %c0_0 = arith.constant 0 : index
    %0 = vector.load %arg0[%c0, %c0_0] : memref<384x384xbf16, #tpu.memory_space<vmem>>, vector<384x384xbf16>
    %c0_1 = arith.constant 0 : index
    %c0_2 = arith.constant 0 : index
    %1 = vector.load %arg1[%c0_1, %c0_2] : memref<384x128xbf16, #tpu.memory_space<vmem>>, vector<384x128xbf16>
    %cst = arith.constant dense<0.000000e+00> : vector<384x128xf32>
    %2 = tpu.matmul %0, %1, %cst {dimension_numbers = #tpu.dot_dimension_numbers<[1], [0], [0], [1], [0, 0, 1, 1], [], []>} : vector<384x384xbf16>, vector<384x128xbf16>, vector<384x128xf32> -> vector<384x128xf32>
    %3 = arith.truncf %2 : vector<384x128xf32> to vector<384x128xbf16>
    %c0_3 = arith.constant 0 : index
    %c0_4 = arith.constant 0 : index
    %4 = vector.load %arg1[%c0_3, %c0_4] : memref<384x128xbf16, #tpu.memory_space<vmem>>, vector<384x128xbf16>
    %5 = tpu.concatenate %3, %4 in 1 : vector<384x128xbf16>, vector<384x128xbf16> -> vector<384x256xbf16>
    %c0_5 = arith.constant 0 : index
    %c0_6 = arith.constant 0 : index
    %6 = vector.load %arg2[%c0_5, %c0_6] : memref<256x128xbf16, #tpu.memory_space<vmem>>, vector<256x128xbf16>
    %cst_7 = arith.constant dense<0.000000e+00> : vector<384x128xf32>
    %7 = tpu.matmul %5, %6, %cst_7 {dimension_numbers = #tpu.dot_dimension_numbers<[1], [0], [0], [1], [0, 0, 1, 1], [], []>} : vector<384x256xbf16>, vector<256x128xbf16>, vector<384x128xf32> -> vector<384x128xf32>
    %c0_8 = arith.constant 0 : index
    %c0_9 = arith.constant 0 : index
    %8 = vector.load %arg3[%c0_8, %c0_9] : memref<1x128xf32, #tpu.memory_space<vmem>>, vector<1x128xf32>
    %9 = vector.broadcast %8 : vector<1x128xf32> to vector<384x128xf32>
    %10 = arith.addf %7, %9 : vector<384x128xf32>
    %cst_10 = arith.constant 0.000000e+00 : f32
    %11 = vector.broadcast %cst_10 : f32 to vector<384x128xf32>
    %12 = arith.maximumf %10, %11 : vector<384x128xf32>
    %13 = arith.truncf %12 : vector<384x128xf32> to vector<384x128xbf16>
    %c0_11 = arith.constant 0 : index
    %c0_12 = arith.constant 0 : index
    %14 = vector.load %arg4[%c0_11, %c0_12] : memref<384x128xbf16, #tpu.memory_space<vmem>>, vector<384x128xbf16>
    tpu.vector_store %arg4[%c0_11, %c0_12], %13 {strides = array<i32>} : memref<384x128xbf16, #tpu.memory_space<vmem>>, vector<384x128xbf16>,
    return
  }
}

module attributes {stable_mosaic.version = 11 : i64} {
  func.func @_sage_small_kernel(%arg0: memref<384x384xbf16, #tpu.memory_space<vmem>>, %arg1: memref<384x128xbf16, #tpu.memory_space<vmem>>, %arg2: memref<256x128xbf16, #tpu.memory_space<vmem>>, %arg3: memref<1x128xf32, #tpu.memory_space<vmem>>, %arg4: memref<384x128xf32, #tpu.memory_space<vmem>>) attributes {dimension_semantics = [], scalar_prefetch = 0 : i64, scratch_operands = 0 : i64, tpu.core_type = #tpu.core_type<tc>} {
    %c0 = arith.constant 0 : index
    %c0_0 = arith.constant 0 : index
    %0 = vector.load %arg0[%c0, %c0_0] : memref<384x384xbf16, #tpu.memory_space<vmem>>, vector<384x384xbf16>
    %c0_1 = arith.constant 0 : index
    %c0_2 = arith.constant 0 : index
    %1 = vector.load %arg1[%c0_1, %c0_2] : memref<384x128xbf16, #tpu.memory_space<vmem>>, vector<384x128xbf16>
    %cst = arith.constant dense<0.000000e+00> : vector<384x128xf32>
    %2 = tpu.matmul %0, %1, %cst {dimension_numbers = #tpu.dot_dimension_numbers<[1], [0], [0], [1], [0, 0, 1, 1], [], []>} : vector<384x384xbf16>, vector<384x128xbf16>, vector<384x128xf32> -> vector<384x128xf32>
    %3 = arith.truncf %2 : vector<384x128xf32> to vector<384x128xbf16>
    %c0_3 = arith.constant 0 : index
    %c0_4 = arith.constant 0 : index
    %4 = vector.load %arg1[%c0_3, %c0_4] : memref<384x128xbf16, #tpu.memory_space<vmem>>, vector<384x128xbf16>
    %5 = tpu.concatenate %3, %4 in 1 : vector<384x128xbf16>, vector<384x128xbf16> -> vector<384x256xbf16>
    %c0_5 = arith.constant 0 : index
    %c0_6 = arith.constant 0 : index
    %6 = vector.load %arg2[%c0_5, %c0_6] : memref<256x128xbf16, #tpu.memory_space<vmem>>, vector<256x128xbf16>
    %cst_7 = arith.constant dense<0.000000e+00> : vector<384x128xf32>
    %7 = tpu.matmul %5, %6, %cst_7 {dimension_numbers = #tpu.dot_dimension_numbers<[1], [0], [0], [1], [0, 0, 1, 1], [], []>} : vector<384x256xbf16>, vector<256x128xbf16>, vector<384x128xf32> -> vector<384x128xf32>
    %c0_8 = arith.constant 0 : index
    %c0_9 = arith.constant 0 : index
    %8 = vector.load %arg3[%c0_8, %c0_9] : memref<1x128xf32, #tpu.memory_space<vmem>>, vector<1x128xf32>
    %9 = vector.broadcast %8 : vector<1x128xf32> to vector<384x128xf32>
    %10 = arith.addf %7, %9 : vector<384x128xf32>
    %c0_10 = arith.constant 0 : index
    %c0_11 = arith.constant 0 : index
    %11 = vector.load %arg4[%c0_10, %c0_11] : memref<384x128xf32, #tpu.memory_space<vmem>>, vector<384x128xf32>
    tpu.vector_store %arg4[%c0_10, %c0_11], %10 {strides = array<i32>} : memref<384x128xf32, #tpu.memory_space<vmem>>, vector<384x128xf32>,
    return
  }
}

</mosaic_0001>

<bundles_post_ra>
// kernel: _gnn_small.3
= control target key start
LH: loop header
LB: loop body
LE: loop exit
PB: predicated region body
PF: predicated region fallthrough
CT: control target
= control target key end

     0   :  { %v2001_v1 = vmov 0   ;;  %s2872_s0 = inlined_call_operand.vmem [shape: bf16[384,384], index: 0, kind: input, shape index: {}]   ;;  %s2873_s1 = inlined_call_operand.vmem [shape: bf16[384,128], index: 1, kind: input, shape index: {}]   ;;  %s2874_s2 = inlined_call_operand.vmem [shape: bf16[256,128], index: 2, kind: input, shape index: {}]   ;;  %s2875_s3 = inlined_call_operand.vmem [shape: f32[1,128], index: 3, kind: input, shape index: {}]   ;;  %s2876_s4 = inlined_call_operand.hbm [shape: f32[384,128], index: 4, kind: output, shape index: {}]  }
   0x1   :  { %v2033_v0 = vld [vmem:[%s2873_s1] sm:$0xff]   ;;  %691 = vmatprep.subr.bf16.mxu0 %v2001_v1  ;;  %v1819_v2 = vld [vmem:[%s2873_s1 + $0x8] sm:$0xff]   ;;  %v1820_v3 = vld [vmem:[%s2873_s1 + $0x10] sm:$0xff]  }
   0x2   :  { %692 = vmatpush1.bf16.msra.mxu0 %v2033_v0  ;;  %v1821_v4 = vld [vmem:[%s2873_s1 + $0x18] sm:$0xff]   ;;  %v1822_v5 = vld [vmem:[%s2873_s1 + $0x20] sm:$0xff]   ;;  %v1823_v6 = vld [vmem:[%s2873_s1 + $0x28] sm:$0xff]  }
   0x3   :  { %693 = vmatprep.subr.bf16.mxu0 %v2001_v1  ;;  %v1836_v7 = vld [vmem:[%s2872_s0 + $0x4] ss:$12 sps:$4 sm:$0xff]   ;;  %v2074_v10 = vld [vmem:[%s2873_s1 + $0x88] sm:$0xff]   ;;  %v1825_v11 = vld [vmem:[%s2873_s1 + $0x38] sm:$0xff]  }
   0x4   :  { %v2062_v8 = vld [vmem:[%s2873_s1 + $0x80] sm:$0xff]   ;;  %723 = vmatprep.mubr.bf16.mxu0 %v1836_v7  ;;  %v1824_v9 = vld [vmem:[%s2873_s1 + $0x30] sm:$0xff]   ;;  %v2090_v13 = vld [vmem:[%s2873_s1 + $0x98] sm:$0xff]  }
   0x5   :  { %1798 = vmatprep.subr.bf16.mxu1 %v2062_v8  ;;  %v2084_v12 = vld [vmem:[%s2873_s1 + $0x90] sm:$0xff]   ;;  %v1826_v14 = vld [vmem:[%s2873_s1 + $0x40] sm:$0xff]   ;;  %v1827_v16 = vld [vmem:[%s2873_s1 + $0x48] sm:$0xff]  }
   0x6   :  { %694 = vmatpush1.bf16.msra.mxu0 %v1819_v2  ;;  %1806 = vmatpush3.bf16.msra.mxu1 %v2062_v8  ;;  %v2102_v15 = vld [vmem:[%s2873_s1 + $0xa0] sm:$0xff]   ;;  %v2111_v17 = vld [vmem:[%s2873_s1 + $0xa8] sm:$0xff]   ;;  %v1828_v19 = vld [vmem:[%s2873_s1 + $0x50] sm:$0xff]  }
   0x7   :  { %695 = vmatprep.subr.bf16.mxu0 %v2001_v1  ;;  %1799 = vmatprep.subr.bf16.mxu1 %v2074_v10  ;;  %v1866_v18 = vld [vmem:[%s2872_s0 + $0xc8] ss:$12 sps:$4 sm:$0xff]   ;;  %v1829_v21 = vld [vmem:[%s2873_s1 + $0x58] sm:$0xff]   ;;  %v1830_v23 = vld [vmem:[%s2873_s1 + $0x60] sm:$0xff]  }
   0x8   :  { %1766 = vmatprep.mubr.bf16.mxu1 %v1866_v18  ;;  %v2127_v20 = vld [vmem:[%s2873_s1 + $0xb0] sm:$0xff]   ;;  %v2138_v22 = vld [vmem:[%s2873_s1 + $0xb8] sm:$0xff]   ;;  %v1831_v24 = vld [vmem:[%s2873_s1 + $0x68] sm:$0xff]  }
   0x9   :  { %v1869_v25 = vld [vmem:[%s2872_s0 + $0xe0] ss:$12 sps:$4 sm:$0xff]   ;;  %v1874_v26 = vld [vmem:[%s2872_s0 + $0xf8] ss:$12 sps:$4 sm:$0xff]   ;;  %v1832_v27 = vld [vmem:[%s2873_s1 + $0x70] sm:$0xff]  }
   0xa   :  { %696 = vmatpush1.bf16.msra.mxu0 %v1820_v3  ;;  %1807 = vmatpush3.bf16.msra.mxu1 %v2074_v10  ;;  %v1877_v28 = vld [vmem:[%s2872_s0 + $0x110] ss:$12 sps:$4 sm:$0xff]   ;;  %v1882_v30 = vld [vmem:[%s2872_s0 + $0x128] ss:$12 sps:$4 sm:$0xff]   ;;  %v1834_v31 = vld [vmem:[%s2872_s0] ss:$12 sps:$4 sm:$0xff]  }
   0xb   :  { %697 = vmatprep.subr.bf16.mxu0 %v2001_v1  ;;  %1800 = vmatprep.subr.bf16.mxu1 %v2084_v12  ;;  %v1833_v29 = vld [vmem:[%s2873_s1 + $0x78] sm:$0xff]   ;;  %v1885_v33 = vld [vmem:[%s2872_s0 + $0x140] ss:$12 sps:$4 sm:$0xff]   ;;  %v1898_v38 = vld [vmem:[%s2872_s0 + $0x188] ss:$12 sps:$4 sm:$0xff]  }
   0xc   :  { %v1838_v32 = vld [vmem:[%s2872_s0 + $0x1c] ss:$12 sps:$4 sm:$0xff]   ;;  %v1890_v34 = vld [vmem:[%s2872_s0 + $0x158] ss:$12 sps:$4 sm:$0xff]   ;;  %v1841_v36 = vld [vmem:[%s2872_s0 + $0x34] ss:$12 sps:$4 sm:$0xff]  }
   0xd   :  { %v1840_v35 = vld [vmem:[%s2872_s0 + $0x18] ss:$12 sps:$4 sm:$0xff]   ;;  %v1893_v37 = vld [vmem:[%s2872_s0 + $0x170] ss:$12 sps:$4 sm:$0xff]   ;;  %v1901_v41 = vld [vmem:[%s2872_s0 + $0x1a0] ss:$12 sps:$4 sm:$0xff]  }
   0xe   :  { %698 = vmatpush1.bf16.msra.mxu0 %v1821_v4  ;;  %1808 = vmatpush3.bf16.msra.mxu1 %v2084_v12  ;;  %v1843_v39 = vld [vmem:[%s2872_s0 + $0x30] ss:$12 sps:$4 sm:$0xff]   ;;  %v1844_v40 = vld [vmem:[%s2872_s0 + $0x4c] ss:$12 sps:$4 sm:$0xff]  }
   0xf   :  { %699 = vmatprep.subr.bf16.mxu0 %v2001_v1  ;;  %1801 = vmatprep.subr.bf16.mxu1 %v2090_v13  ;;  %v1906_v42 = vld [vmem:[%s2872_s0 + $0x1b8] ss:$12 sps:$4 sm:$0xff]  }
  0x12   :  { %700 = vmatpush1.bf16.msra.mxu0 %v1822_v5  ;;  %1809 = vmatpush3.bf16.msra.mxu1 %v2090_v13 }
  0x13   :  { %701 = vmatprep.subr.bf16.mxu0 %v2001_v1  ;;  %1802 = vmatprep.subr.bf16.mxu1 %v2102_v15 }
  0x16   :  { %702 = vmatpush1.bf16.msra.mxu0 %v1823_v6  ;;  %1810 = vmatpush3.bf16.msra.mxu1 %v2102_v15 }
  0x17   :  { %703 = vmatprep.subr.bf16.mxu0 %v2001_v1  ;;  %1803 = vmatprep.subr.bf16.mxu1 %v2111_v17 }
  0x1a   :  { %704 = vmatpush1.bf16.msra.mxu0 %v1824_v9  ;;  %1811 = vmatpush3.bf16.msra.mxu1 %v2111_v17 }
  0x1b   :  { %705 = vmatprep.subr.bf16.mxu0 %v2001_v1  ;;  %1804 = vmatprep.subr.bf16.mxu1 %v2127_v20 }
  0x1e   :  { %706 = vmatpush1.bf16.msra.mxu0 %v1825_v11  ;;  %1812 = vmatpush3.bf16.msra.mxu1 %v2127_v20 }
  0x1f   :  { %707 = vmatprep.subr.bf16.mxu0 %v2001_v1  ;;  %1805 = vmatprep.subr.bf16.mxu1 %v2138_v22 }
  0x22   :  { %708 = vmatpush1.bf16.msra.mxu0 %v1826_v14  ;;  %1813 = vmatpush3.bf16.msra.mxu1 %v2138_v22 }
  0x23   :  { %709 = vmatprep.subr.bf16.mxu0 %v2001_v1  ;;  %1300 = vmatprep.subr.bf16.mxu1 %v2001_v1 }
  0x25   :  { %1767 = vmatmul.mubr.bf16.vlgmr.msra.gmra.mrb[0].mxu1 %v1869_v25 }
  0x26   :  { %710 = vmatpush1.bf16.msra.mxu0 %v1827_v16  ;;  %1770 = vmatprep.mubr.bf16.mxu1 %v1874_v26 }
  0x27   :  { %711 = vmatprep.subr.bf16.mxu0 %v2001_v1 }
  0x2a   :  { %712 = vmatpush1.bf16.msra.mxu0 %v1828_v19 }
  0x2b   :  { %713 = vmatprep.subr.bf16.mxu0 %v2001_v1 }
  0x2d   :  { %1771 = vmatmul.mubr.bf16.gmra.mrb[4].mxu1 %v1877_v28 }
  0x2e   :  { %714 = vmatpush1.bf16.msra.mxu0 %v1829_v21  ;;  %1774 = vmatprep.mubr.bf16.mxu1 %v1882_v30 }
  0x2f   :  { %715 = vmatprep.subr.bf16.mxu0 %v2001_v1 }
  0x32   :  { %716 = vmatpush1.bf16.msra.mxu0 %v1830_v23 }
  0x33   :  { %717 = vmatprep.subr.bf16.mxu0 %v2001_v1 }
  0x35   :  { %1775 = vmatmul.mubr.bf16.gmra.mrb[8].mxu1 %v1885_v33 }
  0x36   :  { %718 = vmatpush1.bf16.msra.mxu0 %v1831_v24  ;;  %1778 = vmatprep.mubr.bf16.mxu1 %v1890_v34 }
  0x37   :  { %719 = vmatprep.subr.bf16.mxu0 %v2001_v1 }
  0x3a   :  { %720 = vmatpush1.bf16.msra.mxu0 %v1832_v27 }
  0x3b   :  { %721 = vmatprep.subr.bf16.mxu0 %v2001_v1 }
  0x3d   :  { %1779 = vmatmul.mubr.bf16.gmra.mrb[12].mxu1 %v1893_v37 }
  0x3e   :  { %722 = vmatpush1.bf16.msra.mxu0 %v1833_v29  ;;  %1782 = vmatprep.mubr.bf16.mxu1 %v1898_v38 }
  0x3f   :  { %1734 = vmatprep.subr.bf16.mxu0 %v2062_v8 }
  0x41   :  { %724 = vmatmul.mubr.bf16.vlgmr.msra.gmra.mrb[0].mxu0 %v1834_v31 }
  0x42   :  { %1735 = vmatpush3.bf16.msra.mxu0 %v2062_v8  ;;  %731 = vmatprep.mubr.bf16.mxu0 %v1838_v32 }
  0x43   :  { %1736 = vmatprep.subr.bf16.mxu0 %v2074_v10 }
  0x46   :  { %1737 = vmatpush3.bf16.msra.mxu0 %v2074_v10 }
  0x47   :  { %1738 = vmatprep.subr.bf16.mxu0 %v2084_v12 }
  0x49   :  { %732 = vmatmul.mubr.bf16.gmra.mrb[4].mxu0 %v1840_v35 }
  0x4a   :  { %739 = vmatprep.mubr.bf16.mxu0 %v1841_v36  ;;  %1739 = vmatpush3.bf16.msra.mxu0 %v2084_v12 }
  0x4b   :  { %1740 = vmatprep.subr.bf16.mxu0 %v2090_v13 }
  0x4e   :  { %1741 = vmatpush3.bf16.msra.mxu0 %v2090_v13 }
  0x4f   :  { %1742 = vmatprep.subr.bf16.mxu0 %v2102_v15 }
  0x51   :  { %740 = vmatmul.mubr.bf16.gmra.mrb[8].mxu0 %v1843_v39 }
  0x52   :  { %747 = vmatprep.mubr.bf16.mxu0 %v1844_v40  ;;  %1743 = vmatpush3.bf16.msra.mxu0 %v2102_v15 }
  0x53   :  { %1744 = vmatprep.subr.bf16.mxu0 %v2111_v17 }
  0x54   :  { %9 = vsyncpa [#allocation3], 0  ;;  %v1846_v43 = vld [vmem:[%s2872_s0 + $0x48] ss:$12 sps:$4 sm:$0xff]   ;;  %1783 = vmatmul.mubr.bf16.gmra.mrb[16].mxu1 %v1901_v41  ;;  %v1848_v44 = vld [vmem:[%s2872_s0 + $0x64] ss:$12 sps:$4 sm:$0xff]  }
  0x55   :  { %1786 = vmatprep.mubr.bf16.mxu1 %v1906_v42  ;;  %v1909_v45 = vld [vmem:[%s2872_s0 + $0x1d0] ss:$12 sps:$4 sm:$0xff]   ;;  %v1914_v46 = vld [vmem:[%s2872_s0 + $0x1e8] ss:$12 sps:$4 sm:$0xff]   ;;  %v1850_v47 = vld [vmem:[%s2872_s0 + $0x60] ss:$12 sps:$4 sm:$0xff]  }
  0x56   :  { %1745 = vmatpush3.bf16.msra.mxu0 %v2111_v17  ;;  %v1851_v48 = vld [vmem:[%s2872_s0 + $0x7c] ss:$12 sps:$4 sm:$0xff]   ;;  %v1917_v49 = vld [vmem:[%s2872_s0 + $0x200] ss:$12 sps:$4 sm:$0xff]   ;;  %v1854_v50 = vld [vmem:[%s2872_s0 + $0x78] ss:$12 sps:$4 sm:$0xff]  }
  0x57   :  { %1746 = vmatprep.subr.bf16.mxu0 %v2127_v20  ;;  %v1856_v51 = vld [vmem:[%s2872_s0 + $0x94] ss:$12 sps:$4 sm:$0xff]   ;;  %v1922_v52 = vld [vmem:[%s2872_s0 + $0x218] ss:$12 sps:$4 sm:$0xff]   ;;  %v1925_v53 = vld [vmem:[%s2872_s0 + $0x230] ss:$12 sps:$4 sm:$0xff]  }
  0x58   :  { %v1859_v54 = vld [vmem:[%s2872_s0 + $0x90] ss:$12 sps:$4 sm:$0xff]   ;;  %v1861_v55 = vld [vmem:[%s2872_s0 + $0xac] ss:$12 sps:$4 sm:$0xff]   ;;  %v1864_v56 = vld [vmem:[%s2872_s0 + $0xa8] ss:$12 sps:$4 sm:$0xff]  }
  0x59   :  { %748 = vmatmul.mubr.bf16.gmra.mrb[12].mxu0 %v1846_v43  ;;  %v1867_v57 = vld [vmem:[%s2872_s0 + $0xc4] ss:$12 sps:$4 sm:$0xff]   ;;  %v1870_v58 = vld [vmem:[%s2872_s0 + $0xc0] ss:$12 sps:$4 sm:$0xff]   ;;  %v1871_v59 = vld [vmem:[%s2872_s0 + $0xdc] ss:$12 sps:$4 sm:$0xff]  }
  0x5a   :  { %755 = vmatprep.mubr.bf16.mxu0 %v1848_v44  ;;  %1747 = vmatpush3.bf16.msra.mxu0 %v2127_v20  ;;  %v1873_v60 = vld [vmem:[%s2872_s0 + $0xd8] ss:$12 sps:$4 sm:$0xff]   ;;  %v1875_v61 = vld [vmem:[%s2872_s0 + $0xf4] ss:$12 sps:$4 sm:$0xff]   ;;  %v1878_v62 = vld [vmem:[%s2872_s0 + $0xf0] ss:$12 sps:$4 sm:$0xff]  }
  0x5b   :  { %1748 = vmatprep.subr.bf16.mxu0 %v2138_v22  ;;  %v1879_v63 = vld [vmem:[%s2872_s0 + $0x10c] ss:$12 sps:$4 sm:$0xff]   ;;  %v1883_v2 = vld [vmem:[%s2872_s0 + $0x124] ss:$12 sps:$4 sm:$0xff]   ;;  %v1887_v4 = vld [vmem:[%s2872_s0 + $0x13c] ss:$12 sps:$4 sm:$0xff]  }
  0x5c   :  { %1787 = vmatmul.mubr.bf16.gmra.mrb[20].mxu1 %v1909_v45  ;;  %v1886_v3 = vld [vmem:[%s2872_s0 + $0x120] ss:$12 sps:$4 sm:$0xff]   ;;  %v1889_v5 = vld [vmem:[%s2872_s0 + $0x138] ss:$12 sps:$4 sm:$0xff]   ;;  %v1894_v7 = vld [vmem:[%s2872_s0 + $0x150] ss:$12 sps:$4 sm:$0xff]  }
  0x5d   :  { %1790 = vmatprep.mubr.bf16.mxu1 %v1914_v46  ;;  %v1891_v6 = vld [vmem:[%s2872_s0 + $0x154] ss:$12 sps:$4 sm:$0xff]   ;;  %v1895_v8 = vld [vmem:[%s2872_s0 + $0x16c] ss:$12 sps:$4 sm:$0xff]   ;;  %v1899_v10 = vld [vmem:[%s2872_s0 + $0x184] ss:$12 sps:$4 sm:$0xff]  }
  0x5e   :  { %1749 = vmatpush3.bf16.msra.mxu0 %v2138_v22  ;;  %v1897_v9 = vld [vmem:[%s2872_s0 + $0x168] ss:$12 sps:$4 sm:$0xff]   ;;  %v1902_v11 = vld [vmem:[%s2872_s0 + $0x180] ss:$12 sps:$4 sm:$0xff]   ;;  %v1905_v13 = vld [vmem:[%s2872_s0 + $0x198] ss:$12 sps:$4 sm:$0xff]  }
  0x5f   :  { %v1903_v12 = vld [vmem:[%s2872_s0 + $0x19c] ss:$12 sps:$4 sm:$0xff]   ;;  %v1907_v14 = vld [vmem:[%s2872_s0 + $0x1b4] ss:$12 sps:$4 sm:$0xff]   ;;  %v1911_v16 = vld [vmem:[%s2872_s0 + $0x1cc] ss:$12 sps:$4 sm:$0xff]  }
  0x60   :  { %v1910_v15 = vld [vmem:[%s2872_s0 + $0x1b0] ss:$12 sps:$4 sm:$0xff]   ;;  %v1913_v17 = vld [vmem:[%s2872_s0 + $0x1c8] ss:$12 sps:$4 sm:$0xff]   ;;  %v1918_v19 = vld [vmem:[%s2872_s0 + $0x1e0] ss:$12 sps:$4 sm:$0xff]  }
  0x61   :  { %756 = vmatmul.mubr.bf16.gmra.mrb[16].mxu0 %v1850_v47  ;;  %v1915_v18 = vld [vmem:[%s2872_s0 + $0x1e4] ss:$12 sps:$4 sm:$0xff]   ;;  %v1919_v20 = vld [vmem:[%s2872_s0 + $0x1fc] ss:$12 sps:$4 sm:$0xff]   ;;  %v1923_v22 = vld [vmem:[%s2872_s0 + $0x214] ss:$12 sps:$4 sm:$0xff]  }
  0x62   :  { %763 = vmatprep.mubr.bf16.mxu0 %v1851_v48  ;;  %v1921_v21 = vld [vmem:[%s2872_s0 + $0x1f8] ss:$12 sps:$4 sm:$0xff]   ;;  %v1926_v23 = vld [vmem:[%s2872_s0 + $0x210] ss:$12 sps:$4 sm:$0xff]   ;;  %v1929_v25 = vld [vmem:[%s2872_s0 + $0x228] ss:$12 sps:$4 sm:$0xff]  }
  0x63   :  { %v1927_v24 = vld [vmem:[%s2872_s0 + $0x22c] ss:$12 sps:$4 sm:$0xff]   ;;  %v1930_v26 = vld [vmem:[%s2872_s0 + $0x8] ss:$12 sps:$4 sm:$0xff]   ;;  %v1933_v29 = vld [vmem:[%s2872_s0 + $0x50] ss:$12 sps:$4 sm:$0xff]  }
  0x64   :  { %1791 = vmatmul.mubr.bf16.gmra.mrb[24].mxu1 %v1917_v49  ;;  %v1931_v27 = vld [vmem:[%s2872_s0 + $0x20] ss:$12 sps:$4 sm:$0xff]   ;;  %v1932_v28 = vld [vmem:[%s2872_s0 + $0x38] ss:$12 sps:$4 sm:$0xff]   ;;  %v1934_v30 = vld [vmem:[%s2872_s0 + $0x68] ss:$12 sps:$4 sm:$0xff]  }
  0x65   :  { %1794 = vmatprep.mubr.bf16.mxu1 %v1922_v52  ;;  %v1935_v35 = vld [vmem:[%s2872_s0 + $0x80] ss:$12 sps:$4 sm:$0xff]   ;;  %v1936_v36 = vld [vmem:[%s2872_s0 + $0x98] ss:$12 sps:$4 sm:$0xff]   ;;  %v1937_v43 = vld [vmem:[%s2872_s0 + $0xb0] ss:$12 sps:$4 sm:$0xff]  }
  0x69   :  { %764 = vmatmul.mubr.bf16.gmra.mrb[20].mxu0 %v1854_v50  ;;  %v1938_v50 = vld [vmem:[%s2874_s2] sm:$0xff]  }
  0x6a   :  { %771 = vmatprep.mubr.bf16.mxu0 %v1856_v51  ;;  %1301 = vmatpush1.bf16.msra.mxu1 %v1938_v50 }
  0x6b   :  { %1302 = vmatprep.subr.bf16.mxu1 %v2001_v1 }
  0x6c   :  { %1795 = vmatmul.mubr.bf16.gmra.mrb[28].mxu1 %v1925_v53 }
  0x6d   :  { %1332 = vmatprep.mubr.bf16.mxu1 %v2033_v0  ;;  %v1881_v0 = vld [vmem:[%s2872_s0 + $0x108] ss:$12 sps:$4 sm:$0xff]  }
  0x71   :  { %772 = vmatmul.mubr.bf16.gmra.mrb[24].mxu0 %v1859_v54 }
  0x72   :  { %779 = vmatprep.mubr.bf16.mxu0 %v1861_v55  ;;  %v1939_v55 = vld [vmem:[%s2874_s2 + $0x8] sm:$0xff]  }
  0x73   :  { %1303 = vmatpush1.bf16.msra.mxu1 %v1939_v55 }
  0x74   :  { %1304 = vmatprep.subr.bf16.mxu1 %v2001_v1 }
  0x79   :  { %780 = vmatmul.mubr.bf16.gmra.mrb[28].mxu0 %v1864_v56 }
  0x7a   :  { %787 = vmatprep.mubr.bf16.mxu0 %v1867_v57 }
  0x81   :  { %788 = vmatmul.mubr.bf16.gmra.mrb[32].mxu0 %v1870_v58 }
  0x82   :  { %795 = vmatprep.mubr.bf16.mxu0 %v1871_v59 }
  0x89   :  { %796 = vmatmul.mubr.bf16.gmra.mrb[36].mxu0 %v1873_v60  ;;  %v1940_v60 = vld [vmem:[%s2874_s2 + $0x10] sm:$0xff]  }
  0x8a   :  { %803 = vmatprep.mubr.bf16.mxu0 %v1875_v61  ;;  %1305 = vmatpush1.bf16.msra.mxu1 %v1940_v60 }
  0x8b   :  { %1306 = vmatprep.subr.bf16.mxu1 %v2001_v1 }
  0x91   :  { %804 = vmatmul.mubr.bf16.gmra.mrb[40].mxu0 %v1878_v62 }
  0x92   :  { %811 = vmatprep.mubr.bf16.mxu0 %v1879_v63 }
  0x99   :  { %812 = vmatmul.mubr.bf16.gmra.mrb[44].mxu0 %v1881_v0 }
  0x9a   :  { %819 = vmatprep.mubr.bf16.mxu0 %v1883_v2  ;;  %v1941_v2 = vld [vmem:[%s2874_s2 + $0x18] sm:$0xff]  }
  0x9b   :  { %1307 = vmatpush1.bf16.msra.mxu1 %v1941_v2  ;;  %v1950_v2 = vld [vmem:[%s2874_s2 + $0x60] sm:$0xff]  }
  0x9c   :  { %1308 = vmatprep.subr.bf16.mxu1 %v2001_v1 }
  0xa1   :  { %820 = vmatmul.mubr.bf16.gmra.mrb[48].mxu0 %v1886_v3 }
  0xa2   :  { %827 = vmatprep.mubr.bf16.mxu0 %v1887_v4 }
  0xa9   :  { %828 = vmatmul.mubr.bf16.gmra.mrb[52].mxu0 %v1889_v5 }
  0xaa   :  { %835 = vmatprep.mubr.bf16.mxu0 %v1891_v6 }
  0xb1   :  { %836 = vmatmul.mubr.bf16.gmra.mrb[56].mxu0 %v1894_v7  ;;  %v1942_v7 = vld [vmem:[%s2874_s2 + $0x20] sm:$0xff]  }
  0xb2   :  { %843 = vmatprep.mubr.bf16.mxu0 %v1895_v8  ;;  %1309 = vmatpush1.bf16.msra.mxu1 %v1942_v7 }
  0xb3   :  { %1310 = vmatprep.subr.bf16.mxu1 %v2001_v1 }
  0xb9   :  { %844 = vmatmul.mubr.bf16.gmra.mrb[60].mxu0 %v1897_v9 }
  0xba   :  { %851 = vmatprep.mubr.bf16.mxu0 %v1899_v10 }
  0xc1   :  { %852 = vmatmul.mubr.bf16.gmra.mrb[64].mxu0 %v1902_v11 }
  0xc2   :  { %859 = vmatprep.mubr.bf16.mxu0 %v1903_v12  ;;  %v1943_v12 = vld [vmem:[%s2874_s2 + $0x28] sm:$0xff]  }
  0xc3   :  { %1311 = vmatpush1.bf16.msra.mxu1 %v1943_v12 }
  0xc4   :  { %1312 = vmatprep.subr.bf16.mxu1 %v2001_v1 }
  0xc9   :  { %860 = vmatmul.mubr.bf16.gmra.mrb[68].mxu0 %v1905_v13 }
  0xca   :  { %867 = vmatprep.mubr.bf16.mxu0 %v1907_v14 }
  0xd1   :  { %868 = vmatmul.mubr.bf16.gmra.mrb[72].mxu0 %v1910_v15 }
  0xd2   :  { %875 = vmatprep.mubr.bf16.mxu0 %v1911_v16 }
  0xd9   :  { %876 = vmatmul.mubr.bf16.gmra.mrb[76].mxu0 %v1913_v17  ;;  %v1944_v17 = vld [vmem:[%s2874_s2 + $0x30] sm:$0xff]  }
  0xda   :  { %883 = vmatprep.mubr.bf16.mxu0 %v1915_v18  ;;  %1313 = vmatpush1.bf16.msra.mxu1 %v1944_v17  ;;  %v1951_v17 = vld [vmem:[%s2874_s2 + $0x68] sm:$0xff]  }
  0xdb   :  { %1314 = vmatprep.subr.bf16.mxu1 %v2001_v1 }
  0xe1   :  { %884 = vmatmul.mubr.bf16.gmra.mrb[80].mxu0 %v1918_v19 }
  0xe2   :  { %891 = vmatprep.mubr.bf16.mxu0 %v1919_v20 }
  0xe9   :  { %892 = vmatmul.mubr.bf16.gmra.mrb[84].mxu0 %v1921_v21 }
  0xea   :  { %899 = vmatprep.mubr.bf16.mxu0 %v1923_v22  ;;  %v1945_v22 = vld [vmem:[%s2874_s2 + $0x38] sm:$0xff]  }
  0xeb   :  { %1315 = vmatpush1.bf16.msra.mxu1 %v1945_v22 }
  0xec   :  { %1316 = vmatprep.subr.bf16.mxu1 %v2001_v1 }
  0xf1   :  { %900 = vmatmul.mubr.bf16.gmra.mrb[88].mxu0 %v1926_v23 }
  0xf2   :  { %907 = vmatprep.mubr.bf16.mxu0 %v1927_v24 }
  0xf8   :  { %v2378_v31 = vpop.f32.mrb[0].mxu1 }
  0xf9   :  { %908 = vmatmul.mubr.bf16.gmra.mrb[92].mxu0 %v1929_v25  ;;  %v2380_v32 = vpop.f32.mrb[1].mxu1 }
  0xfa   :  { %1750 = vmatprep.mubr.bf16.mxu0 %v1930_v26  ;;  %v2382_v33 = vpop.f32.mrb[2].mxu1 }
  0xfb   :  { %v2384_v34 = vpop.f32.mrb[3].mxu1 }
 0x100   :  { %v2392_v37 = vpop.f32.mrb[4].mxu1 }
 0x101   :  { %1751 = vmatmul.mubr.bf16.vlgmr.msra.gmra.mrb[96].mxu0 %v1931_v27  ;;  %v2394_v38 = vpop.f32.mrb[5].mxu1  ;;  %v1946_v27 = vld [vmem:[%s2874_s2 + $0x40] sm:$0xff]  }
 0x102   :  { %1754 = vmatprep.mubr.bf16.mxu0 %v1932_v28  ;;  %v2396_v39 = vpop.f32.mrb[6].mxu1  ;;  %1317 = vmatpush1.bf16.msra.mxu1 %v1946_v27 }
 0x103   :  { %v2398_v40 = vpop.f32.mrb[7].mxu1  ;;  %1318 = vmatprep.subr.bf16.mxu1 %v2001_v1 }
 0x108   :  { %v2407_v46 = vpop.f32.mrb[8].mxu1 }
 0x109   :  { %1755 = vmatmul.mubr.bf16.gmra.mrb[100].mxu0 %v1933_v29  ;;  %v2409_v47 = vpop.f32.mrb[9].mxu1 }
 0x10a   :  { %1758 = vmatprep.mubr.bf16.mxu0 %v1934_v30  ;;  %v2411_v48 = vpop.f32.mrb[10].mxu1 }
 0x10b   :  { %v2413_v49 = vpop.f32.mrb[11].mxu1 }
 0x110   :  { %v2426_v56 = vpop.f32.mrb[12].mxu1 }
 0x111   :  { %1759 = vmatmul.mubr.bf16.gmra.mrb[104].mxu0 %v1935_v35  ;;  %v2428_v57 = vpop.f32.mrb[13].mxu1 }
 0x112   :  { %1762 = vmatprep.mubr.bf16.mxu0 %v1936_v36  ;;  %v2430_v58 = vpop.f32.mrb[14].mxu1  ;;  %v1947_v36 = vld [vmem:[%s2874_s2 + $0x48] sm:$0xff]  }
 0x113   :  { %v2433_v59 = vpop.f32.mrb[15].mxu1  ;;  %1319 = vmatpush1.bf16.msra.mxu1 %v1947_v36 }
 0x114   :  { %v2400_v41 = vpop.f32.mrb[0].mxu0  ;;  %1320 = vmatprep.subr.bf16.mxu1 %v2001_v1 }
 0x115   :  { %v727_v42 = vpop.f32.mrb[1].mxu0 }
 0x116   :  { %v2405_v44 = vpop.f32.mrb[2].mxu0 }
 0x117   :  { %v730_v45 = vpop.f32.mrb[3].mxu0 }
 0x119   :  { %1763 = vmatmul.mubr.bf16.gmra.mrb[108].mxu0 %v1937_v43  ;;  %v1948_v43 = vld [vmem:[%s2874_s2 + $0x50] sm:$0xff]  }
 0x11a   :  { %1321 = vmatpush1.bf16.msra.mxu1 %v1948_v43  ;;  %v1953_v43 = vld [vmem:[%s2874_s2 + $0x78] sm:$0xff]  }
 0x11b   :  { %1322 = vmatprep.subr.bf16.mxu1 %v2001_v1 }
 0x11c   :  { %v2418_v51 = vpop.f32.mrb[4].mxu0 }
 0x11d   :  { %v735_v52 = vpop.f32.mrb[5].mxu0 }
 0x11e   :  { %v2420_v53 = vpop.f32.mrb[6].mxu0 }
 0x11f   :  { %v738_v54 = vpop.f32.mrb[7].mxu0 }
 0x124   :  { %v2438_v61 = vpop.f32.mrb[8].mxu0 }
 0x125   :  { %v743_v62 = vpop.f32.mrb[9].mxu0 }
 0x126   :  { %v2440_v63 = vpop.f32.mrb[10].mxu0 }
 0x127   :  { %v746_v0 = vpop.f32.mrb[11].mxu0  ;;  %v2446_v3 = vpop.f32.mrb[16].mxu1 }
 0x128   :  { %v2448_v4 = vpop.f32.mrb[17].mxu1  ;;  %v1949_v0 = vld [vmem:[%s2874_s2 + $0x58] sm:$0xff]  }
 0x129   :  { %v2450_v5 = vpop.f32.mrb[18].mxu1  ;;  %1323 = vmatpush1.bf16.msra.mxu1 %v1949_v0 }
 0x12a   :  { %v2453_v6 = vpop.f32.mrb[19].mxu1  ;;  %1324 = vmatprep.subr.bf16.mxu1 %v2001_v1 }
 0x12c   :  { %v2458_v8 = vpop.f32.mrb[12].mxu0 }
 0x12d   :  { %v751_v9 = vpop.f32.mrb[13].mxu0  ;;  %1325 = vmatpush1.bf16.msra.mxu1 %v1950_v2 }
 0x12e   :  { %v2460_v10 = vpop.f32.mrb[14].mxu0  ;;  %1326 = vmatprep.subr.bf16.mxu1 %v2001_v1 }
 0x12f   :  { %v754_v11 = vpop.f32.mrb[15].mxu0  ;;  %v2466_v13 = vpop.f32.mrb[20].mxu1 }
 0x130   :  { %v2468_v14 = vpop.f32.mrb[21].mxu1 }
 0x131   :  { %v2470_v15 = vpop.f32.mrb[22].mxu1  ;;  %1327 = vmatpush1.bf16.msra.mxu1 %v1951_v17 }
 0x132   :  { %v2473_v16 = vpop.f32.mrb[23].mxu1  ;;  %1328 = vmatprep.subr.bf16.mxu1 %v2001_v1 }
 0x134   :  { %v2478_v18 = vpop.f32.mrb[16].mxu0 }
 0x135   :  { %v759_v19 = vpop.f32.mrb[17].mxu0 }
 0x136   :  { %v2480_v20 = vpop.f32.mrb[18].mxu0  ;;  %v1952_v19 = vld [vmem:[%s2874_s2 + $0x70] sm:$0xff]  }
 0x137   :  { %v762_v21 = vpop.f32.mrb[19].mxu0  ;;  %v2486_v23 = vpop.f32.mrb[24].mxu1  ;;  %1329 = vmatpush1.bf16.msra.mxu1 %v1952_v19 }
 0x138   :  { %v2488_v24 = vpop.f32.mrb[25].mxu1  ;;  %1330 = vmatprep.subr.bf16.mxu1 %v2001_v1 }
 0x139   :  { %v2490_v25 = vpop.f32.mrb[26].mxu1 }
 0x13a   :  { %v2493_v26 = vpop.f32.mrb[27].mxu1 }
 0x13b   :  { %1331 = vmatpush1.bf16.msra.mxu1 %v1953_v43 }
 0x13c   :  { %v2498_v28 = vpop.f32.mrb[20].mxu0 }
 0x13d   :  { %v767_v29 = vpop.f32.mrb[21].mxu0 }
 0x13e   :  { %v2500_v30 = vpop.f32.mrb[22].mxu0 }
 0x13f   :  { %v770_v35 = vpop.f32.mrb[23].mxu0  ;;  %v2506_v42 = vpop.f32.mrb[28].mxu1 }
 0x140   :  { %v2514_v50 = vpop.f32.mrb[29].mxu1 }
 0x141   :  { %v2516_v54 = vpop.f32.mrb[30].mxu1 }
 0x142   :  { %v2520_v60 = vpop.f32.mrb[31].mxu1 }
 0x144   :  { %v2512_v45 = vpop.f32.mrb[24].mxu0 }
 0x145   :  { %v775_v52 = vpop.f32.mrb[25].mxu0 }
 0x146   :  { %v2518_v55 = vpop.f32.mrb[26].mxu0 }
 0x147   :  { %v778_v62 = vpop.f32.mrb[27].mxu0 }
 0x14c   :  { %v2530_v7 = vpop.f32.mrb[28].mxu0 }
 0x14d   :  { %v783_v9 = vpop.f32.mrb[29].mxu0 }
 0x14e   :  { %v2532_v11 = vpop.f32.mrb[30].mxu0 }
 0x14f   :  { %v786_v12 = vpop.f32.mrb[31].mxu0 }
 0x154   :  { %v789_v21 = vpop.f32.mrb[32].mxu0 }
 0x155   :  { %v2543_v22 = vadd.f32 %v2380_v32, %v789_v21  ;;  %v791_v27 = vpop.f32.mrb[33].mxu0 }
 0x156   :  { %v792_v29 = vpop.f32.mrb[34].mxu0 }
 0x157   :  { %v2547_v35 = vadd.f32 %v2384_v34, %v792_v29  ;;  %v794_v36 = vpop.f32.mrb[35].mxu0 }
 0x159   :  { %v1149_v52 = vpack.c.bf16 %v2547_v35, %v2543_v22  ;;  %v1964_v22 = vld [vmem:[%s2873_s1 + $0x58] sm:$0xff]  }
 0x15c   :  { %v797_v62 = vpop.f32.mrb[36].mxu0 }
 0x15d   :  { %v2555_v32 = vadd.f32 %v2378_v31, %v797_v62  ;;  %v799_v0 = vpop.f32.mrb[37].mxu0 }
 0x15e   :  { %v800_v2 = vpop.f32.mrb[38].mxu0 }
 0x15f   :  { %v2558_v1 = vadd.f32 %v2382_v33, %v800_v2  ;;  %v802_v34 = vpop.f32.mrb[39].mxu0 }
 0x161   :  { %v1150_v9 = vpack.c.bf16 %v2558_v1, %v2555_v32  ;;  %v1966_v1 = vld [vmem:[%s2873_s1 + $0x68] sm:$0xff]  }
 0x164   :  { %v805_v12 = vpop.f32.mrb[40].mxu0 }
 0x165   :  { %v2563_v17 = vadd.f32 %v2394_v38, %v805_v12  ;;  %v807_v19 = vpop.f32.mrb[41].mxu0 }
 0x166   :  { %v808_v21 = vpop.f32.mrb[42].mxu0 }
 0x167   :  { %v2566_v27 = vadd.f32 %v2398_v40, %v808_v21  ;;  %v810_v31 = vpop.f32.mrb[43].mxu0 }
 0x16c   :  { %v813_v36 = vpop.f32.mrb[44].mxu0 }
 0x16d   :  { %v2571_v33 = vadd.f32 %v2392_v37, %v813_v36  ;;  %v815_v43 = vpop.f32.mrb[45].mxu0 }
 0x16e   :  { %v816_v62 = vpop.f32.mrb[46].mxu0 }
 0x16f   :  { %v2574_v0 = vadd.f32 %v2396_v39, %v816_v62  ;;  %v818_v38 = vpop.f32.mrb[47].mxu0 }
 0x171   :  { %v2878_v35 = vpack.c.bf16 %v2574_v0, %v2571_v33  ;;  %v1968_v33 = vld [vmem:[%s2873_s1 + $0x78] sm:$0xff]  }
 0x174   :  { %v821_v34 = vpop.f32.mrb[48].mxu0 }
 0x175   :  { %v2579_v40 = vadd.f32 %v2409_v47, %v821_v34  ;;  %v823_v12 = vpop.f32.mrb[49].mxu0 }
 0x176   :  { %v824_v19 = vpop.f32.mrb[50].mxu0 }
 0x177   :  { %v2582_v21 = vadd.f32 %v2413_v49, %v824_v19  ;;  %v826_v37 = vpop.f32.mrb[51].mxu0 }
 0x179   :  { %v2879_v32 = vpack.c.bf16 %v2582_v21, %v2579_v40  ;;  %v1969_v40 = vld [vmem:[%s2873_s1 + $0x80] sm:$0xff]  }
 0x17c   :  { %v829_v36 = vpop.f32.mrb[52].mxu0 }
 0x17d   :  { %v2587_v39 = vadd.f32 %v2407_v46, %v829_v36  ;;  %v831_v43 = vpop.f32.mrb[53].mxu0 }
 0x17e   :  { %v832_v62 = vpop.f32.mrb[54].mxu0 }
 0x17f   :  { %v2590_v38 = vadd.f32 %v2411_v48, %v832_v62  ;;  %v834_v47 = vpop.f32.mrb[55].mxu0 }
 0x184   :  { %v837_v12 = vpop.f32.mrb[56].mxu0 }
 0x185   :  { %v2595_v49 = vadd.f32 %v2428_v57, %v837_v12  ;;  %v839_v19 = vpop.f32.mrb[57].mxu0 }
 0x186   :  { %v840_v37 = vpop.f32.mrb[58].mxu0 }
 0x187   :  { %v2598_v31 = vadd.f32 %v2433_v59, %v840_v37  ;;  %v842_v46 = vpop.f32.mrb[59].mxu0 }
 0x18c   :  { %v845_v43 = vpop.f32.mrb[60].mxu0 }
 0x18d   :  { %v2603_v48 = vadd.f32 %v2426_v56, %v845_v43  ;;  %v847_v62 = vpop.f32.mrb[61].mxu0 }
 0x18e   :  { %v848_v47 = vpop.f32.mrb[62].mxu0 }
 0x18f   :  { %v2606_v34 = vadd.f32 %v2430_v58, %v848_v47  ;;  %v850_v57 = vpop.f32.mrb[63].mxu0 }
 0x191   :  { %v2882_v0 = vpack.c.bf16 %v2606_v34, %v2603_v48  ;;  %v1973_v48 = vld [vmem:[%s2873_s1 + $0xa0] sm:$0xff]  }
 0x194   :  { %v853_v19 = vpop.f32.mrb[64].mxu0 }
 0x195   :  { %v2611_v59 = vadd.f32 %v2448_v4, %v853_v19  ;;  %v855_v37 = vpop.f32.mrb[65].mxu0 }
 0x196   :  { %v856_v46 = vpop.f32.mrb[66].mxu0 }
 0x197   :  { %v2614_v36 = vadd.f32 %v2453_v6, %v856_v46  ;;  %v858_v56 = vpop.f32.mrb[67].mxu0 }
 0x199   :  { %v2883_v21 = vpack.c.bf16 %v2614_v36, %v2611_v59  ;;  %v1974_v59 = vld [vmem:[%s2873_s1 + $0xa8] sm:$0xff]  }
 0x19c   :  { %v861_v62 = vpop.f32.mrb[68].mxu0 }
 0x19d   :  { %v2619_v58 = vadd.f32 %v2446_v3, %v861_v62  ;;  %v863_v47 = vpop.f32.mrb[69].mxu0 }
 0x19e   :  { %v864_v57 = vpop.f32.mrb[70].mxu0 }
 0x19f   :  { %v2622_v12 = vadd.f32 %v2450_v5, %v864_v57  ;;  %v866_v4 = vpop.f32.mrb[71].mxu0 }
 0x1a4   :  { %v869_v37 = vpop.f32.mrb[72].mxu0 }
 0x1a5   :  { %v2627_v6 = vadd.f32 %v2468_v14, %v869_v37  ;;  %v871_v46 = vpop.f32.mrb[73].mxu0 }
 0x1a6   :  { %v872_v56 = vpop.f32.mrb[74].mxu0 }
 0x1a7   :  { %v2630_v43 = vadd.f32 %v2473_v16, %v872_v56  ;;  %v874_v3 = vpop.f32.mrb[75].mxu0 }
 0x1a9   :  { %v2885_v34 = vpack.c.bf16 %v2630_v43, %v2627_v6  ;;  %v1976_v6 = vld [vmem:[%s2873_s1 + $0xb8] sm:$0xff]  }
 0x1ac   :  { %v877_v47 = vpop.f32.mrb[76].mxu0 }
 0x1ad   :  { %v2635_v5 = vadd.f32 %v2466_v13, %v877_v47  ;;  %v879_v57 = vpop.f32.mrb[77].mxu0 }
 0x1ae   :  { %v880_v4 = vpop.f32.mrb[78].mxu0 }
 0x1af   :  { %v2638_v19 = vadd.f32 %v2470_v15, %v880_v4  ;;  %v882_v14 = vpop.f32.mrb[79].mxu0 }
 0x1b1   :  { %v2886_v36 = vpack.c.bf16 %v2638_v19, %v2635_v5 }
 0x1b4   :  { %v885_v46 = vpop.f32.mrb[80].mxu0 }
 0x1b5   :  { %v2643_v16 = vadd.f32 %v2488_v24, %v885_v46  ;;  %v887_v56 = vpop.f32.mrb[81].mxu0 }
 0x1b6   :  { %v888_v3 = vpop.f32.mrb[82].mxu0 }
 0x1b7   :  { %v2646_v62 = vadd.f32 %v2493_v26, %v888_v3  ;;  %v890_v13 = vpop.f32.mrb[83].mxu0 }
 0x1bc   :  { %v893_v57 = vpop.f32.mrb[84].mxu0 }
 0x1bd   :  { %v2651_v15 = vadd.f32 %v2486_v23, %v893_v57  ;;  %v895_v4 = vpop.f32.mrb[85].mxu0 }
 0x1be   :  { %v896_v14 = vpop.f32.mrb[86].mxu0 }
 0x1bf   :  { %v2654_v37 = vadd.f32 %v2490_v25, %v896_v14  ;;  %v898_v24 = vpop.f32.mrb[87].mxu0 }
 0x1c1   :  { %v2888_v43 = vpack.c.bf16 %v2654_v37, %v2651_v15 }
 0x1c4   :  { %v901_v56 = vpop.f32.mrb[88].mxu0 }
 0x1c5   :  { %v2659_v26 = vadd.f32 %v2514_v50, %v901_v56  ;;  %v903_v3 = vpop.f32.mrb[89].mxu0 }
 0x1c6   :  { %v904_v13 = vpop.f32.mrb[90].mxu0 }
 0x1c7   :  { %v2662_v47 = vadd.f32 %v2520_v60, %v904_v13  ;;  %v906_v23 = vpop.f32.mrb[91].mxu0 }
 0x1c9   :  { %v2889_v19 = vpack.c.bf16 %v2662_v47, %v2659_v26 }
 0x1cc   :  { %v909_v4 = vpop.f32.mrb[92].mxu0 }
 0x1cd   :  { %v2667_v25 = vadd.f32 %v2506_v42, %v909_v4  ;;  %v911_v14 = vpop.f32.mrb[93].mxu0 }
 0x1ce   :  { %v912_v24 = vpop.f32.mrb[94].mxu0 }
 0x1cf   :  { %v2670_v46 = vadd.f32 %v2516_v54, %v912_v24  ;;  %v914_v50 = vpop.f32.mrb[95].mxu0 }
 0x1d1   :  { %v1164_v56 = vpack.c.bf16 %v2670_v46, %v2667_v25 }
 0x1d4   :  { %v1752_v3 = vpop.f32.mrb[96].mxu0 }
 0x1d5   :  { %v959_v60 = vadd.f32 %v1752_v3, %v2418_v51  ;;  %v950_v13 = vpop.f32.mrb[97].mxu0  ;;  %v1954_v51 = vld [vmem:[%s2873_s1 + $0x8] sm:$0xff]  }
 0x1d6   :  { %v951_v23 = vadd.f32 %v950_v13, %v2400_v41  ;;  %v1753_v57 = vpop.f32.mrb[98].mxu0 }
 0x1d7   :  { %v962_v2 = vadd.f32 %v1753_v57, %v2420_v53  ;;  %v953_v42 = vpop.f32.mrb[99].mxu0 }
 0x1d8   :  { %v954_v4 = vadd.f32 %v953_v42, %v2405_v44 }
 0x1d9   :  { %v1142_v14 = vpack.c.bf16 %v962_v2, %v959_v60 }
 0x1da   :  { %v1141_v29 = vpack.c.bf16 %v954_v4, %v951_v23  ;;  %v1955_v23 = vld [vmem:[%s2873_s1 + $0x10] sm:$0xff]  }
 0x1dc   :  { %v1756_v54 = vpop.f32.mrb[100].mxu0  ;;  %1333 = vmatmul.mubr.bf16.vlgmr.msra.gmra.mrb[32].mxu1 %v1141_v29 }
 0x1dd   :  { %v975_v24 = vadd.f32 %v1756_v54, %v2458_v8  ;;  %v966_v50 = vpop.f32.mrb[101].mxu0  ;;  %1340 = vmatprep.mubr.bf16.mxu1 %v1954_v51  ;;  %v1956_v51 = vld [vmem:[%s2873_s1 + $0x18] sm:$0xff]  }
 0x1de   :  { %v967_v41 = vadd.f32 %v966_v50, %v2438_v61  ;;  %v1757_v3 = vpop.f32.mrb[102].mxu0 }
 0x1df   :  { %v978_v53 = vadd.f32 %v1757_v3, %v2460_v10  ;;  %v969_v57 = vpop.f32.mrb[103].mxu0 }
 0x1e0   :  { %v970_v44 = vadd.f32 %v969_v57, %v2440_v63 }
 0x1e1   :  { %v1144_v2 = vpack.c.bf16 %v978_v53, %v975_v24 }
 0x1e2   :  { %v1143_v60 = vpack.c.bf16 %v970_v44, %v967_v41  ;;  %v1958_v44 = vld [vmem:[%s2873_s1 + $0x28] sm:$0xff]  }
 0x1e4   :  { %v1760_v13 = vpop.f32.mrb[104].mxu0  ;;  %1341 = vmatmul.mubr.bf16.gmra.mrb[36].mxu1 %v1142_v14 }
 0x1e5   :  { %v991_v8 = vadd.f32 %v1760_v13, %v2498_v28  ;;  %v982_v29 = vpop.f32.mrb[105].mxu0  ;;  %1348 = vmatprep.mubr.bf16.mxu1 %v1955_v23  ;;  %v2877_v13 = vpack.c.bf16 %v2566_v27, %v2563_v17  ;;  %v1967_v17 = vld [vmem:[%s2873_s1 + $0x70] sm:$0xff]   ;;  %v2881_v27 = vpack.c.bf16 %v2598_v31, %v2595_v49  ;;  %v1970_v31 = vld [vmem:[%s2873_s1 + $0x88] sm:$0xff]   ;;  %v1972_v49 = vld [vmem:[%s2873_s1 + $0x98] sm:$0xff]  }
 0x1e6   :  { %v983_v61 = vadd.f32 %v982_v29, %v2478_v18  ;;  %v1761_v42 = vpop.f32.mrb[106].mxu0 }
 0x1e7   :  { %v994_v10 = vadd.f32 %v1761_v42, %v2500_v30  ;;  %v985_v4 = vpop.f32.mrb[107].mxu0 }
 0x1e8   :  { %v986_v63 = vadd.f32 %v985_v4, %v2480_v20 }
 0x1e9   :  { %v1146_v54 = vpack.c.bf16 %v994_v10, %v991_v8 }
 0x1ea   :  { %v1145_v24 = vpack.c.bf16 %v986_v63, %v983_v61 }
 0x1ec   :  { %v1764_v50 = vpop.f32.mrb[108].mxu0  ;;  %1349 = vmatmul.mubr.bf16.gmra.mrb[40].mxu1 %v1143_v60  ;;  %v1963_v60 = vld [vmem:[%s2873_s1 + $0x50] sm:$0xff]  }
 0x1ed   :  { %v1007_v28 = vadd.f32 %v1764_v50, %v2530_v7  ;;  %v998_v14 = vpop.f32.mrb[109].mxu0  ;;  %1356 = vmatprep.mubr.bf16.mxu1 %v1956_v51  ;;  %v1957_v7 = vld [vmem:[%s2873_s1 + $0x20] sm:$0xff]  }
 0x1ee   :  { %v999_v18 = vadd.f32 %v998_v14, %v2512_v45  ;;  %v1765_v41 = vpop.f32.mrb[110].mxu0  ;;  %v1959_v45 = vld [vmem:[%s2873_s1 + $0x30] sm:$0xff]  }
 0x1ef   :  { %v1010_v30 = vadd.f32 %v1765_v41, %v2532_v11  ;;  %v1001_v3 = vpop.f32.mrb[111].mxu0  ;;  %v1961_v11 = vld [vmem:[%s2873_s1 + $0x40] sm:$0xff]  }
 0x1f0   :  { %v1002_v20 = vadd.f32 %v1001_v3, %v2518_v55  ;;  %v1960_v55 = vld [vmem:[%s2873_s1 + $0x38] sm:$0xff]  }
 0x1f1   :  { %v1148_v53 = vpack.c.bf16 %v1010_v30, %v1007_v28 }
 0x1f2   :  { %v1147_v57 = vpack.c.bf16 %v1002_v20, %v999_v18 }
 0x1f4   :  { %1357 = vmatmul.mubr.bf16.gmra.mrb[44].mxu1 %v1144_v2  ;;  %v1962_v2 = vld [vmem:[%s2873_s1 + $0x48] sm:$0xff]  }
 0x1f5   :  { %1364 = vmatprep.mubr.bf16.mxu1 %v1957_v7 }
 0x1fc   :  { %1365 = vmatmul.mubr.bf16.gmra.mrb[48].mxu1 %v1145_v24 }
 0x1fd   :  { %1372 = vmatprep.mubr.bf16.mxu1 %v1958_v44 }
 0x204   :  { %1373 = vmatmul.mubr.bf16.gmra.mrb[52].mxu1 %v1146_v54 }
 0x205   :  { %1380 = vmatprep.mubr.bf16.mxu1 %v1959_v45 }
 0x20c   :  { %1381 = vmatmul.mubr.bf16.gmra.mrb[56].mxu1 %v1147_v57 }
 0x20d   :  { %1388 = vmatprep.mubr.bf16.mxu1 %v1960_v55 }
 0x214   :  { %1389 = vmatmul.mubr.bf16.gmra.mrb[60].mxu1 %v1148_v53 }
 0x215   :  { %1396 = vmatprep.mubr.bf16.mxu1 %v1961_v11 }
 0x21c   :  { %1397 = vmatmul.mubr.bf16.gmra.mrb[64].mxu1 %v1149_v52  ;;  %v1965_v52 = vld [vmem:[%s2873_s1 + $0x60] sm:$0xff]  }
 0x21d   :  { %1404 = vmatprep.mubr.bf16.mxu1 %v1962_v2 }
 0x224   :  { %1405 = vmatmul.mubr.bf16.gmra.mrb[68].mxu1 %v1150_v9  ;;  %v2880_v9 = vpack.c.bf16 %v2590_v38, %v2587_v39  ;;  %v2884_v39 = vpack.c.bf16 %v2622_v12, %v2619_v58  ;;  %v1971_v38 = vld [vmem:[%s2873_s1 + $0x90] sm:$0xff]   ;;  %v2887_v12 = vpack.c.bf16 %v2646_v62, %v2643_v16  ;;  %v2810_v62 = vld [vmem:[%s2875_s3] ss:$0 sm:$0xff] }
 0x225   :  { %1412 = vmatprep.mubr.bf16.mxu1 %v1963_v60  ;;  %v1975_v58 = vld [vmem:[%s2873_s1 + $0xb0] sm:$0xff]   ;;  %s2002_s1 = smov [#allocation2]  }
 0x226   :  { %s1578_s3 = sshll.u32 %s2002_s1, 4  ;;  %s1579_s3 = int_to_ptr.vmem [resolvable:$true] %s1578_s3 }
 0x227   :  { %s1977_s22 = scalar_lea.vmem %s1579_s3, 6144  ;;  %p1982_p1 = scmp.lt.s32.totalorder %s1579_s3, %s1579_s3 }
 0x228   :  { %p1978_p0 = scmp.ne.s32.totalorder %s1579_s3, %s1977_s22  ;;  %p1983_p2 = scmp.lt.s32.totalorder %s1977_s22, %s1977_s22 }
 0x22a   :  { %p1984_p3 = por %p1983_p2, %p1982_p1 }
 0x22c   :  { %1413 = vmatmul.mubr.bf16.gmra.mrb[72].mxu1 %v2877_v13  ;;  %p1985_p4 = pnand %p1984_p3, %p1978_p0 }
 0x22d   :  { %1420 = vmatprep.mubr.bf16.mxu1 %v1964_v22 }
 0x234   :  { %1421 = vmatmul.mubr.bf16.gmra.mrb[76].mxu1 %v2878_v35 }
 0x235   :  { %1428 = vmatprep.mubr.bf16.mxu1 %v1965_v52 }
 0x23c   :  { %1429 = vmatmul.mubr.bf16.gmra.mrb[80].mxu1 %v2879_v32 }
 0x23d   :  { %1436 = vmatprep.mubr.bf16.mxu1 %v1966_v1 }
 0x244   :  { %1437 = vmatmul.mubr.bf16.gmra.mrb[84].mxu1 %v2880_v9 }
 0x245   :  { %1444 = vmatprep.mubr.bf16.mxu1 %v1967_v17 }
 0x24c   :  { %1445 = vmatmul.mubr.bf16.gmra.mrb[88].mxu1 %v2881_v27 }
 0x24d   :  { %1452 = vmatprep.mubr.bf16.mxu1 %v1968_v33 }
 0x254   :  { %1453 = vmatmul.mubr.bf16.gmra.mrb[92].mxu1 %v2882_v0 }
 0x255   :  { %1460 = vmatprep.mubr.bf16.mxu1 %v1969_v40 }
 0x25c   :  { %1461 = vmatmul.mubr.bf16.gmra.mrb[96].mxu1 %v2883_v21 }
 0x25d   :  { %1468 = vmatprep.mubr.bf16.mxu1 %v1970_v31 }
 0x264   :  { %1469 = vmatmul.mubr.bf16.gmra.mrb[100].mxu1 %v2884_v39 }
 0x265   :  { %1476 = vmatprep.mubr.bf16.mxu1 %v1971_v38 }
 0x26c   :  { %1477 = vmatmul.mubr.bf16.gmra.mrb[104].mxu1 %v2885_v34 }
 0x26d   :  { %1484 = vmatprep.mubr.bf16.mxu1 %v1972_v49 }
 0x274   :  { %1485 = vmatmul.mubr.bf16.gmra.mrb[108].mxu1 %v2886_v36 }
 0x275   :  { %1492 = vmatprep.mubr.bf16.mxu1 %v1973_v48 }
 0x27c   :  { %1493 = vmatmul.mubr.bf16.gmra.mrb[112].mxu1 %v2887_v12 }
 0x27d   :  { %1500 = vmatprep.mubr.bf16.mxu1 %v1974_v59 }
 0x284   :  { %1501 = vmatmul.mubr.bf16.gmra.mrb[116].mxu1 %v2888_v43 }
 0x285   :  { %1508 = vmatprep.mubr.bf16.mxu1 %v1975_v58 }
 0x28c   :  { %1509 = vmatmul.mubr.bf16.gmra.mrb[120].mxu1 %v2889_v19 }
 0x28d   :  { %1516 = vmatprep.mubr.bf16.mxu1 %v1976_v6 }
 0x294   :  { %1517 = vmatmul.mubr.bf16.gmra.mrb[124].mxu1 %v1164_v56 }
 0x2af   :  { %v1334_v5 = vpop.f32.mrb[32].mxu1 }
 0x2b0   :  { %v1335_v37 = vadd.f32 %v2810_v62, %v1334_v5  ;;  %v1336_v16 = vpop.f32.mrb[33].mxu1 }
 0x2b1   :  { %v1337_v47 = vpop.f32.mrb[34].mxu1 }
 0x2b2   :  { %1525 = vst [vmem:[#allocation2] sm:$0xff] %v1335_v37  ;;  %v1338_v15 = vadd.f32 %v2810_v62, %v1337_v47  ;;  %v1339_v26 = vpop.f32.mrb[35].mxu1 }
 0x2b4   :  { %1526 = vst [vmem:[#allocation2 + $0x8] sm:$0xff] %v1338_v15 }
 0x2b7   :  { %v1342_v8 = vpop.f32.mrb[36].mxu1 }
 0x2b8   :  { %v1343_v29 = vadd.f32 %v2810_v62, %v1342_v8  ;;  %v1344_v46 = vpop.f32.mrb[37].mxu1 }
 0x2b9   :  { %v1345_v25 = vpop.f32.mrb[38].mxu1 }
 0x2ba   :  { %1527 = vst [vmem:[#allocation2 + $0x10] sm:$0xff] %v1343_v29  ;;  %v1346_v56 = vadd.f32 %v2810_v62, %v1345_v25  ;;  %v1347_v23 = vpop.f32.mrb[39].mxu1 }
 0x2bc   :  { %1528 = vst [vmem:[#allocation2 + $0x18] sm:$0xff] %v1346_v56 }
 0x2bf   :  { %v1350_v61 = vpop.f32.mrb[40].mxu1 }
 0x2c0   :  { %v1351_v42 = vadd.f32 %v2810_v62, %v1350_v61  ;;  %v1352_v10 = vpop.f32.mrb[41].mxu1 }
 0x2c1   :  { %v1353_v4 = vpop.f32.mrb[42].mxu1 }
 0x2c2   :  { %1529 = vst [vmem:[#allocation2 + $0x20] sm:$0xff] %v1351_v42  ;;  %v1354_v63 = vadd.f32 %v2810_v62, %v1353_v4  ;;  %v1355_v54 = vpop.f32.mrb[43].mxu1 }
 0x2c4   :  { %1530 = vst [vmem:[#allocation2 + $0x28] sm:$0xff] %v1354_v63 }
 0x2c7   :  { %v1358_v24 = vpop.f32.mrb[44].mxu1 }
 0x2c8   :  { %v1359_v50 = vadd.f32 %v2810_v62, %v1358_v24  ;;  %v1360_v28 = vpop.f32.mrb[45].mxu1 }
 0x2c9   :  { %v1361_v14 = vpop.f32.mrb[46].mxu1 }
 0x2ca   :  { %1531 = vst [vmem:[#allocation2 + $0x30] sm:$0xff] %v1359_v50  ;;  %v1362_v51 = vadd.f32 %v2810_v62, %v1361_v14  ;;  %v1363_v18 = vpop.f32.mrb[47].mxu1 }
 0x2cc   :  { %1532 = vst [vmem:[#allocation2 + $0x38] sm:$0xff] %v1362_v51 }
 0x2cf   :  { %v1366_v41 = vpop.f32.mrb[48].mxu1 }
 0x2d0   :  { %v1367_v30 = vadd.f32 %v2810_v62, %v1366_v41  ;;  %v1368_v3 = vpop.f32.mrb[49].mxu1 }
 0x2d1   :  { %v1369_v20 = vpop.f32.mrb[50].mxu1 }
 0x2d2   :  { %1533 = vst [vmem:[#allocation2 + $0x40] sm:$0xff] %v1367_v30  ;;  %v1370_v53 = vadd.f32 %v2810_v62, %v1369_v20  ;;  %v1371_v57 = vpop.f32.mrb[51].mxu1 }
 0x2d4   :  { %1534 = vst [vmem:[#allocation2 + $0x48] sm:$0xff] %v1370_v53 }
 0x2d7   :  { %v1374_v7 = vpop.f32.mrb[52].mxu1 }
 0x2d8   :  { %v1375_v44 = vadd.f32 %v2810_v62, %v1374_v7  ;;  %v1376_v45 = vpop.f32.mrb[53].mxu1 }
 0x2d9   :  { %v1377_v55 = vpop.f32.mrb[54].mxu1 }
 0x2da   :  { %1535 = vst [vmem:[#allocation2 + $0x50] sm:$0xff] %v1375_v44  ;;  %v1378_v11 = vadd.f32 %v2810_v62, %v1377_v55  ;;  %v1379_v2 = vpop.f32.mrb[55].mxu1 }
 0x2dc   :  { %1536 = vst [vmem:[#allocation2 + $0x58] sm:$0xff] %v1378_v11 }
 0x2df   :  { %v1382_v60 = vpop.f32.mrb[56].mxu1 }
 0x2e0   :  { %v1383_v13 = vadd.f32 %v2810_v62, %v1382_v60  ;;  %v1384_v22 = vpop.f32.mrb[57].mxu1 }
 0x2e1   :  { %v1385_v35 = vpop.f32.mrb[58].mxu1 }
 0x2e2   :  { %1537 = vst [vmem:[#allocation2 + $0x60] sm:$0xff] %v1383_v13  ;;  %v1386_v52 = vadd.f32 %v2810_v62, %v1385_v35  ;;  %v1387_v32 = vpop.f32.mrb[59].mxu1 }
 0x2e4   :  { %1538 = vst [vmem:[#allocation2 + $0x68] sm:$0xff] %v1386_v52 }
 0x2e7   :  { %v1390_v1 = vpop.f32.mrb[60].mxu1 }
 0x2e8   :  { %v1391_v9 = vadd.f32 %v2810_v62, %v1390_v1  ;;  %v1392_v17 = vpop.f32.mrb[61].mxu1 }
 0x2e9   :  { %v1393_v27 = vpop.f32.mrb[62].mxu1 }
 0x2ea   :  { %1539 = vst [vmem:[#allocation2 + $0x70] sm:$0xff] %v1391_v9  ;;  %v1394_v33 = vadd.f32 %v2810_v62, %v1393_v27  ;;  %v1395_v0 = vpop.f32.mrb[63].mxu1 }
 0x2ec   :  { %1540 = vst [vmem:[#allocation2 + $0x78] sm:$0xff] %v1394_v33 }
 0x2ef   :  { %v1398_v40 = vpop.f32.mrb[64].mxu1 }
 0x2f0   :  { %v1399_v21 = vadd.f32 %v2810_v62, %v1398_v40  ;;  %v1400_v31 = vpop.f32.mrb[65].mxu1 }
 0x2f1   :  { %v1401_v39 = vpop.f32.mrb[66].mxu1 }
 0x2f2   :  { %1541 = vst [vmem:[#allocation2 + $0x80] sm:$0xff] %v1399_v21  ;;  %v1402_v38 = vadd.f32 %v2810_v62, %v1401_v39  ;;  %v1403_v34 = vpop.f32.mrb[67].mxu1 }
 0x2f4   :  { %1542 = vst [vmem:[#allocation2 + $0x88] sm:$0xff] %v1402_v38 }
 0x2f7   :  { %v1406_v49 = vpop.f32.mrb[68].mxu1 }
 0x2f8   :  { %v1407_v36 = vadd.f32 %v2810_v62, %v1406_v49  ;;  %v1408_v48 = vpop.f32.mrb[69].mxu1 }
 0x2f9   :  { %v1409_v12 = vpop.f32.mrb[70].mxu1 }
 0x2fa   :  { %1543 = vst [vmem:[#allocation2 + $0x90] sm:$0xff] %v1407_v36  ;;  %v1410_v59 = vadd.f32 %v2810_v62, %v1409_v12  ;;  %v1411_v43 = vpop.f32.mrb[71].mxu1 }
 0x2fc   :  { %1544 = vst [vmem:[#allocation2 + $0x98] sm:$0xff] %v1410_v59 }
 0x2ff   :  { %v1414_v58 = vpop.f32.mrb[72].mxu1 }
 0x300   :  { %v1415_v19 = vadd.f32 %v2810_v62, %v1414_v58  ;;  %v1416_v6 = vpop.f32.mrb[73].mxu1 }
 0x301   :  { %v1417_v5 = vpop.f32.mrb[74].mxu1 }
 0x302   :  { %1545 = vst [vmem:[#allocation2 + $0xa0] sm:$0xff] %v1415_v19  ;;  %v1418_v37 = vadd.f32 %v2810_v62, %v1417_v5  ;;  %v1419_v16 = vpop.f32.mrb[75].mxu1 }
 0x304   :  { %1546 = vst [vmem:[#allocation2 + $0xa8] sm:$0xff] %v1418_v37 }
 0x307   :  { %v1422_v47 = vpop.f32.mrb[76].mxu1 }
 0x308   :  { %v1423_v15 = vadd.f32 %v2810_v62, %v1422_v47  ;;  %v1424_v26 = vpop.f32.mrb[77].mxu1 }
 0x309   :  { %v1425_v8 = vpop.f32.mrb[78].mxu1 }
 0x30a   :  { %1547 = vst [vmem:[#allocation2 + $0xb0] sm:$0xff] %v1423_v15  ;;  %v1426_v29 = vadd.f32 %v2810_v62, %v1425_v8  ;;  %v1427_v46 = vpop.f32.mrb[79].mxu1 }
 0x30c   :  { %1548 = vst [vmem:[#allocation2 + $0xb8] sm:$0xff] %v1426_v29 }
 0x30f   :  { %v1430_v25 = vpop.f32.mrb[80].mxu1 }
 0x310   :  { %v1431_v56 = vadd.f32 %v2810_v62, %v1430_v25  ;;  %v1432_v23 = vpop.f32.mrb[81].mxu1 }
 0x311   :  { %v1433_v61 = vpop.f32.mrb[82].mxu1 }
 0x312   :  { %1549 = vst [vmem:[#allocation2 + $0xc0] sm:$0xff] %v1431_v56  ;;  %v1434_v42 = vadd.f32 %v2810_v62, %v1433_v61  ;;  %v1435_v10 = vpop.f32.mrb[83].mxu1 }
 0x314   :  { %1550 = vst [vmem:[#allocation2 + $0xc8] sm:$0xff] %v1434_v42 }
 0x317   :  { %v1438_v4 = vpop.f32.mrb[84].mxu1 }
 0x318   :  { %v1439_v63 = vadd.f32 %v2810_v62, %v1438_v4  ;;  %v1440_v54 = vpop.f32.mrb[85].mxu1 }
 0x319   :  { %v1441_v24 = vpop.f32.mrb[86].mxu1 }
 0x31a   :  { %1551 = vst [vmem:[#allocation2 + $0xd0] sm:$0xff] %v1439_v63  ;;  %v1442_v50 = vadd.f32 %v2810_v62, %v1441_v24  ;;  %v1443_v28 = vpop.f32.mrb[87].mxu1 }
 0x31c   :  { %1552 = vst [vmem:[#allocation2 + $0xd8] sm:$0xff] %v1442_v50 }
 0x31f   :  { %v1446_v14 = vpop.f32.mrb[88].mxu1 }
 0x320   :  { %v1447_v51 = vadd.f32 %v2810_v62, %v1446_v14  ;;  %v1448_v18 = vpop.f32.mrb[89].mxu1 }
 0x321   :  { %v1449_v41 = vpop.f32.mrb[90].mxu1 }
 0x322   :  { %1553 = vst [vmem:[#allocation2 + $0xe0] sm:$0xff] %v1447_v51  ;;  %v1450_v30 = vadd.f32 %v2810_v62, %v1449_v41  ;;  %v1451_v3 = vpop.f32.mrb[91].mxu1 }
 0x324   :  { %1554 = vst [vmem:[#allocation2 + $0xe8] sm:$0xff] %v1450_v30 }
 0x327   :  { %v1454_v20 = vpop.f32.mrb[92].mxu1 }
 0x328   :  { %v1455_v53 = vadd.f32 %v2810_v62, %v1454_v20  ;;  %v1456_v57 = vpop.f32.mrb[93].mxu1 }
 0x329   :  { %v1457_v7 = vpop.f32.mrb[94].mxu1 }
 0x32a   :  { %1555 = vst [vmem:[#allocation2 + $0xf0] sm:$0xff] %v1455_v53  ;;  %v1458_v44 = vadd.f32 %v2810_v62, %v1457_v7  ;;  %v1459_v45 = vpop.f32.mrb[95].mxu1 }
 0x32c   :  { %1556 = vst [vmem:[#allocation2 + $0xf8] sm:$0xff] %v1458_v44 }
 0x32f   :  { %v1462_v55 = vpop.f32.mrb[96].mxu1 }
 0x330   :  { %v1463_v11 = vadd.f32 %v2810_v62, %v1462_v55  ;;  %v1464_v2 = vpop.f32.mrb[97].mxu1 }
 0x331   :  { %v1465_v60 = vpop.f32.mrb[98].mxu1 }
 0x332   :  { %1557 = vst [vmem:[#allocation2 + $0x100] sm:$0xff] %v1463_v11  ;;  %v1466_v13 = vadd.f32 %v2810_v62, %v1465_v60  ;;  %v1467_v22 = vpop.f32.mrb[99].mxu1 }
 0x334   :  { %1558 = vst [vmem:[#allocation2 + $0x108] sm:$0xff] %v1466_v13 }
 0x337   :  { %v1470_v35 = vpop.f32.mrb[100].mxu1 }
 0x338   :  { %v1471_v52 = vadd.f32 %v2810_v62, %v1470_v35  ;;  %v1472_v32 = vpop.f32.mrb[101].mxu1 }
 0x339   :  { %v1473_v1 = vpop.f32.mrb[102].mxu1 }
 0x33a   :  { %1559 = vst [vmem:[#allocation2 + $0x110] sm:$0xff] %v1471_v52  ;;  %v1474_v9 = vadd.f32 %v2810_v62, %v1473_v1  ;;  %v1475_v17 = vpop.f32.mrb[103].mxu1 }
 0x33c   :  { %1560 = vst [vmem:[#allocation2 + $0x118] sm:$0xff] %v1474_v9 }
 0x33f   :  { %v1478_v27 = vpop.f32.mrb[104].mxu1 }
 0x340   :  { %v1479_v33 = vadd.f32 %v2810_v62, %v1478_v27  ;;  %v1480_v0 = vpop.f32.mrb[105].mxu1 }
 0x341   :  { %v1481_v40 = vpop.f32.mrb[106].mxu1 }
 0x342   :  { %1561 = vst [vmem:[#allocation2 + $0x120] sm:$0xff] %v1479_v33  ;;  %v1482_v21 = vadd.f32 %v2810_v62, %v1481_v40  ;;  %v1483_v31 = vpop.f32.mrb[107].mxu1 }
 0x344   :  { %1562 = vst [vmem:[#allocation2 + $0x128] sm:$0xff] %v1482_v21 }
 0x347   :  { %v1486_v39 = vpop.f32.mrb[108].mxu1 }
 0x348   :  { %v1487_v38 = vadd.f32 %v2810_v62, %v1486_v39  ;;  %v1488_v34 = vpop.f32.mrb[109].mxu1 }
 0x349   :  { %v1489_v49 = vpop.f32.mrb[110].mxu1 }
 0x34a   :  { %1563 = vst [vmem:[#allocation2 + $0x130] sm:$0xff] %v1487_v38  ;;  %v1490_v36 = vadd.f32 %v2810_v62, %v1489_v49  ;;  %v1491_v48 = vpop.f32.mrb[111].mxu1 }
 0x34c   :  { %1564 = vst [vmem:[#allocation2 + $0x138] sm:$0xff] %v1490_v36 }
 0x34f   :  { %v1494_v12 = vpop.f32.mrb[112].mxu1 }
 0x350   :  { %v1495_v59 = vadd.f32 %v2810_v62, %v1494_v12  ;;  %v1496_v43 = vpop.f32.mrb[113].mxu1 }
 0x351   :  { %v1497_v58 = vpop.f32.mrb[114].mxu1 }
 0x352   :  { %1565 = vst [vmem:[#allocation2 + $0x140] sm:$0xff] %v1495_v59  ;;  %v1498_v19 = vadd.f32 %v2810_v62, %v1497_v58  ;;  %v1499_v6 = vpop.f32.mrb[115].mxu1 }
 0x354   :  { %1566 = vst [vmem:[#allocation2 + $0x148] sm:$0xff] %v1498_v19 }
 0x357   :  { %v1502_v5 = vpop.f32.mrb[116].mxu1 }
 0x358   :  { %v1503_v37 = vadd.f32 %v2810_v62, %v1502_v5  ;;  %v1504_v16 = vpop.f32.mrb[117].mxu1 }
 0x359   :  { %v1505_v47 = vpop.f32.mrb[118].mxu1 }
 0x35a   :  { %1567 = vst [vmem:[#allocation2 + $0x150] sm:$0xff] %v1503_v37  ;;  %v1506_v15 = vadd.f32 %v2810_v62, %v1505_v47  ;;  %v1507_v26 = vpop.f32.mrb[119].mxu1 }
 0x35c   :  { %1568 = vst [vmem:[#allocation2 + $0x158] sm:$0xff] %v1506_v15 }
 0x35f   :  { %v1510_v8 = vpop.f32.mrb[120].mxu1 }
 0x360   :  { %v1511_v29 = vadd.f32 %v2810_v62, %v1510_v8  ;;  %v1512_v46 = vpop.f32.mrb[121].mxu1 }
 0x361   :  { %v1513_v25 = vpop.f32.mrb[122].mxu1 }
 0x362   :  { %1569 = vst [vmem:[#allocation2 + $0x160] sm:$0xff] %v1511_v29  ;;  %v1514_v56 = vadd.f32 %v2810_v62, %v1513_v25  ;;  %v1515_v23 = vpop.f32.mrb[123].mxu1 }
 0x364   :  { %1570 = vst [vmem:[#allocation2 + $0x168] sm:$0xff] %v1514_v56 }
 0x367   :  { %v1518_v61 = vpop.f32.mrb[124].mxu1 }
 0x368   :  { %v1519_v42 = vadd.f32 %v2810_v62, %v1518_v61  ;;  %v1520_v10 = vpop.f32.mrb[125].mxu1 }
 0x369   :  { %v1521_v4 = vpop.f32.mrb[126].mxu1 }
 0x36a   :  { %1571 = vst [vmem:[#allocation2 + $0x170] sm:$0xff] %v1519_v42  ;;  %v1522_v63 = vadd.f32 %v2810_v62, %v1521_v4  ;;  %v1523_v54 = vpop.f32.mrb[127].mxu1 }
 0x36c   :  { %1572 = vst [vmem:[#allocation2 + $0x178] sm:$0xff] %v1522_v63 }
 0x36d   :  { %1988 = shalt.err (!%p1985_p4)
}
 0x36e   :  { %s1989_s25 = scalar_lea.hbm %s2876_s4, 6144 }
 0x36f   :  { %p1990_p5 = scmp.ne.s32.totalorder %s2876_s4, %s1989_s25  ;;  %p1993_p6 = scmp.lt.u32.totalorder %s1989_s25, %s2876_s4 }
 0x371   :  { %p1995_p7 = pnand %p1993_p6, %p1990_p5 }
 0x373   :  { %1998 = shalt.err (!%p1995_p7)
}
 0x374   :  { %s2003_s2 = smov 128   ;;  %s2004_s29 = smov 8  }
 0x375   :  { %1584 = dma.vmem_to_hbm [thread:$0]  %s1579_s3, 6144, %s2876_s4, [#allocation3], %s2003_s2, %s2003_s2, %s2004_s29  }
 0x376   :  { %1999 = dma.done.wait [#allocation3], 6144  }
 0x377   :  { %2000 = vsyncadd [#allocation3], 4294961152 }
 0x378   :  { %1588 = vsyncpa [#allocation3], 1 }

// kernel: _gnn_small.2
= control target key start
LH: loop header
LB: loop body
LE: loop exit
PB: predicated region body
PF: predicated region fallthrough
CT: control target
= control target key end

     0   :  { %v2440_v0 = vmov 0   ;;  %s3368_s1 = inlined_call_operand.vmem [shape: bf16[384,128], index: 1, kind: input, shape index: {}]   ;;  %s3369_s0 = inlined_call_operand.vmem [shape: bf16[384,384], index: 0, kind: input, shape index: {}]   ;;  %s3370_s2 = inlined_call_operand.vmem [shape: bf16[256,128], index: 2, kind: input, shape index: {}]   ;;  %s3371_s3 = inlined_call_operand.vmem [shape: f32[1,128], index: 3, kind: input, shape index: {}]   ;;  %s3372_s4 = inlined_call_operand.vmem [shape: bf16[384,128], index: 4, kind: output, shape index: {}]  }
   0x1   :  { %690 = vmatprep.subr.bf16.mxu0 %v2440_v0  ;;  %v2470_v1 = vld [vmem:[%s3368_s1] sm:$0xff]   ;;  %v2282_v2 = vld [vmem:[%s3368_s1 + $0x8] sm:$0xff]   ;;  %v2283_v3 = vld [vmem:[%s3368_s1 + $0x10] sm:$0xff]  }
   0x2   :  { %691 = vmatpush1.bf16.msra.mxu0 %v2470_v1  ;;  %v2284_v4 = vld [vmem:[%s3368_s1 + $0x18] sm:$0xff]   ;;  %v2285_v5 = vld [vmem:[%s3368_s1 + $0x20] sm:$0xff]   ;;  %v2286_v6 = vld [vmem:[%s3368_s1 + $0x28] sm:$0xff]  }
   0x3   :  { %692 = vmatprep.subr.bf16.mxu0 %v2440_v0  ;;  %v2299_v7 = vld [vmem:[%s3369_s0 + $0x4] ss:$12 sps:$4 sm:$0xff]   ;;  %v2510_v10 = vld [vmem:[%s3368_s1 + $0x88] sm:$0xff]   ;;  %v2288_v11 = vld [vmem:[%s3368_s1 + $0x38] sm:$0xff]  }
   0x4   :  { %v2498_v8 = vld [vmem:[%s3368_s1 + $0x80] sm:$0xff]   ;;  %722 = vmatprep.mubr.bf16.mxu0 %v2299_v7  ;;  %v2287_v9 = vld [vmem:[%s3368_s1 + $0x30] sm:$0xff]   ;;  %v2526_v13 = vld [vmem:[%s3368_s1 + $0x98] sm:$0xff]  }
   0x5   :  { %2264 = vmatprep.subr.bf16.mxu1 %v2498_v8  ;;  %v2520_v12 = vld [vmem:[%s3368_s1 + $0x90] sm:$0xff]   ;;  %v2289_v14 = vld [vmem:[%s3368_s1 + $0x40] sm:$0xff]   ;;  %v2290_v16 = vld [vmem:[%s3368_s1 + $0x48] sm:$0xff]  }
   0x6   :  { %693 = vmatpush1.bf16.msra.mxu0 %v2282_v2  ;;  %2272 = vmatpush3.bf16.msra.mxu1 %v2498_v8  ;;  %v2538_v15 = vld [vmem:[%s3368_s1 + $0xa0] sm:$0xff]   ;;  %v2547_v17 = vld [vmem:[%s3368_s1 + $0xa8] sm:$0xff]   ;;  %v2291_v19 = vld [vmem:[%s3368_s1 + $0x50] sm:$0xff]  }
   0x7   :  { %694 = vmatprep.subr.bf16.mxu0 %v2440_v0  ;;  %2265 = vmatprep.subr.bf16.mxu1 %v2510_v10  ;;  %v2329_v18 = vld [vmem:[%s3369_s0 + $0xc8] ss:$12 sps:$4 sm:$0xff]   ;;  %v2292_v21 = vld [vmem:[%s3368_s1 + $0x58] sm:$0xff]   ;;  %v2293_v23 = vld [vmem:[%s3368_s1 + $0x60] sm:$0xff]  }
   0x8   :  { %2232 = vmatprep.mubr.bf16.mxu1 %v2329_v18  ;;  %v2563_v20 = vld [vmem:[%s3368_s1 + $0xb0] sm:$0xff]   ;;  %v2574_v22 = vld [vmem:[%s3368_s1 + $0xb8] sm:$0xff]   ;;  %v2294_v24 = vld [vmem:[%s3368_s1 + $0x68] sm:$0xff]  }
   0x9   :  { %v2332_v25 = vld [vmem:[%s3369_s0 + $0xe0] ss:$12 sps:$4 sm:$0xff]   ;;  %v2337_v26 = vld [vmem:[%s3369_s0 + $0xf8] ss:$12 sps:$4 sm:$0xff]   ;;  %v2295_v27 = vld [vmem:[%s3368_s1 + $0x70] sm:$0xff]  }
   0xa   :  { %695 = vmatpush1.bf16.msra.mxu0 %v2283_v3  ;;  %2273 = vmatpush3.bf16.msra.mxu1 %v2510_v10  ;;  %v2340_v28 = vld [vmem:[%s3369_s0 + $0x110] ss:$12 sps:$4 sm:$0xff]   ;;  %v2345_v30 = vld [vmem:[%s3369_s0 + $0x128] ss:$12 sps:$4 sm:$0xff]   ;;  %v2297_v31 = vld [vmem:[%s3369_s0] ss:$12 sps:$4 sm:$0xff]  }
   0xb   :  { %696 = vmatprep.subr.bf16.mxu0 %v2440_v0  ;;  %2266 = vmatprep.subr.bf16.mxu1 %v2520_v12  ;;  %v2296_v29 = vld [vmem:[%s3368_s1 + $0x78] sm:$0xff]   ;;  %v2348_v33 = vld [vmem:[%s3369_s0 + $0x140] ss:$12 sps:$4 sm:$0xff]   ;;  %v2361_v38 = vld [vmem:[%s3369_s0 + $0x188] ss:$12 sps:$4 sm:$0xff]  }
   0xc   :  { %v2301_v32 = vld [vmem:[%s3369_s0 + $0x1c] ss:$12 sps:$4 sm:$0xff]   ;;  %v2353_v34 = vld [vmem:[%s3369_s0 + $0x158] ss:$12 sps:$4 sm:$0xff]   ;;  %v2304_v36 = vld [vmem:[%s3369_s0 + $0x34] ss:$12 sps:$4 sm:$0xff]  }
   0xd   :  { %v2303_v35 = vld [vmem:[%s3369_s0 + $0x18] ss:$12 sps:$4 sm:$0xff]   ;;  %v2356_v37 = vld [vmem:[%s3369_s0 + $0x170] ss:$12 sps:$4 sm:$0xff]   ;;  %v2364_v41 = vld [vmem:[%s3369_s0 + $0x1a0] ss:$12 sps:$4 sm:$0xff]  }
   0xe   :  { %697 = vmatpush1.bf16.msra.mxu0 %v2284_v4  ;;  %2274 = vmatpush3.bf16.msra.mxu1 %v2520_v12  ;;  %v2306_v39 = vld [vmem:[%s3369_s0 + $0x30] ss:$12 sps:$4 sm:$0xff]   ;;  %v2307_v40 = vld [vmem:[%s3369_s0 + $0x4c] ss:$12 sps:$4 sm:$0xff]   ;;  %v2309_v43 = vld [vmem:[%s3369_s0 + $0x48] ss:$12 sps:$4 sm:$0xff]  }
   0xf   :  { %698 = vmatprep.subr.bf16.mxu0 %v2440_v0  ;;  %2267 = vmatprep.subr.bf16.mxu1 %v2526_v13  ;;  %v2369_v42 = vld [vmem:[%s3369_s0 + $0x1b8] ss:$12 sps:$4 sm:$0xff]   ;;  %v2372_v45 = vld [vmem:[%s3369_s0 + $0x1d0] ss:$12 sps:$4 sm:$0xff]   ;;  %v2377_v46 = vld [vmem:[%s3369_s0 + $0x1e8] ss:$12 sps:$4 sm:$0xff]  }
  0x10   :  { %v2311_v44 = vld [vmem:[%s3369_s0 + $0x64] ss:$12 sps:$4 sm:$0xff]   ;;  %v2313_v47 = vld [vmem:[%s3369_s0 + $0x60] ss:$12 sps:$4 sm:$0xff]   ;;  %v2314_v48 = vld [vmem:[%s3369_s0 + $0x7c] ss:$12 sps:$4 sm:$0xff]  }
  0x11   :  { %v2380_v49 = vld [vmem:[%s3369_s0 + $0x200] ss:$12 sps:$4 sm:$0xff]   ;;  %v2317_v50 = vld [vmem:[%s3369_s0 + $0x78] ss:$12 sps:$4 sm:$0xff]   ;;  %v2388_v53 = vld [vmem:[%s3369_s0 + $0x230] ss:$12 sps:$4 sm:$0xff]  }
  0x12   :  { %699 = vmatpush1.bf16.msra.mxu0 %v2285_v5  ;;  %2275 = vmatpush3.bf16.msra.mxu1 %v2526_v13  ;;  %v2319_v51 = vld [vmem:[%s3369_s0 + $0x94] ss:$12 sps:$4 sm:$0xff]   ;;  %v2385_v52 = vld [vmem:[%s3369_s0 + $0x218] ss:$12 sps:$4 sm:$0xff]   ;;  %v2322_v54 = vld [vmem:[%s3369_s0 + $0x90] ss:$12 sps:$4 sm:$0xff]  }
  0x13   :  { %700 = vmatprep.subr.bf16.mxu0 %v2440_v0  ;;  %2268 = vmatprep.subr.bf16.mxu1 %v2538_v15  ;;  %v2324_v55 = vld [vmem:[%s3369_s0 + $0xac] ss:$12 sps:$4 sm:$0xff]   ;;  %v2327_v56 = vld [vmem:[%s3369_s0 + $0xa8] ss:$12 sps:$4 sm:$0xff]   ;;  %v2330_v57 = vld [vmem:[%s3369_s0 + $0xc4] ss:$12 sps:$4 sm:$0xff]  }
  0x14   :  { %v2333_v58 = vld [vmem:[%s3369_s0 + $0xc0] ss:$12 sps:$4 sm:$0xff]   ;;  %v2334_v59 = vld [vmem:[%s3369_s0 + $0xdc] ss:$12 sps:$4 sm:$0xff]   ;;  %v2336_v60 = vld [vmem:[%s3369_s0 + $0xd8] ss:$12 sps:$4 sm:$0xff]  }
  0x15   :  { %v2338_v61 = vld [vmem:[%s3369_s0 + $0xf4] ss:$12 sps:$4 sm:$0xff]   ;;  %v2341_v62 = vld [vmem:[%s3369_s0 + $0xf0] ss:$12 sps:$4 sm:$0xff]   ;;  %v2342_v63 = vld [vmem:[%s3369_s0 + $0x10c] ss:$12 sps:$4 sm:$0xff]  }
  0x16   :  { %701 = vmatpush1.bf16.msra.mxu0 %v2286_v6  ;;  %2276 = vmatpush3.bf16.msra.mxu1 %v2538_v15  ;;  %v2346_v2 = vld [vmem:[%s3369_s0 + $0x124] ss:$12 sps:$4 sm:$0xff]   ;;  %v2349_v3 = vld [vmem:[%s3369_s0 + $0x120] ss:$12 sps:$4 sm:$0xff]   ;;  %v2350_v4 = vld [vmem:[%s3369_s0 + $0x13c] ss:$12 sps:$4 sm:$0xff]  }
  0x17   :  { %702 = vmatprep.subr.bf16.mxu0 %v2440_v0  ;;  %2269 = vmatprep.subr.bf16.mxu1 %v2547_v17  ;;  %v2352_v5 = vld [vmem:[%s3369_s0 + $0x138] ss:$12 sps:$4 sm:$0xff]   ;;  %v2354_v6 = vld [vmem:[%s3369_s0 + $0x154] ss:$12 sps:$4 sm:$0xff]   ;;  %v2357_v7 = vld [vmem:[%s3369_s0 + $0x150] ss:$12 sps:$4 sm:$0xff]  }
  0x18   :  { %v2378_v18 = vld [vmem:[%s3369_s0 + $0x1e4] ss:$12 sps:$4 sm:$0xff]  }
  0x1a   :  { %703 = vmatpush1.bf16.msra.mxu0 %v2287_v9  ;;  %2277 = vmatpush3.bf16.msra.mxu1 %v2547_v17  ;;  %v2360_v9 = vld [vmem:[%s3369_s0 + $0x168] ss:$12 sps:$4 sm:$0xff]  }
  0x1b   :  { %704 = vmatprep.subr.bf16.mxu0 %v2440_v0  ;;  %2270 = vmatprep.subr.bf16.mxu1 %v2563_v20 }
  0x1e   :  { %705 = vmatpush1.bf16.msra.mxu0 %v2288_v11  ;;  %2278 = vmatpush3.bf16.msra.mxu1 %v2563_v20  ;;  %v2365_v11 = vld [vmem:[%s3369_s0 + $0x180] ss:$12 sps:$4 sm:$0xff]  }
  0x1f   :  { %706 = vmatprep.subr.bf16.mxu0 %v2440_v0  ;;  %2271 = vmatprep.subr.bf16.mxu1 %v2574_v22 }
  0x22   :  { %707 = vmatpush1.bf16.msra.mxu0 %v2289_v14  ;;  %2279 = vmatpush3.bf16.msra.mxu1 %v2574_v22  ;;  %v2370_v14 = vld [vmem:[%s3369_s0 + $0x1b4] ss:$12 sps:$4 sm:$0xff]  }
  0x23   :  { %708 = vmatprep.subr.bf16.mxu0 %v2440_v0  ;;  %1299 = vmatprep.subr.bf16.mxu1 %v2440_v0 }
  0x25   :  { %2233 = vmatmul.mubr.bf16.vlgmr.msra.gmra.mrb[0].mxu1 %v2332_v25  ;;  %v2392_v25 = vld [vmem:[%s3369_s0 + $0x228] ss:$12 sps:$4 sm:$0xff]  }
  0x26   :  { %709 = vmatpush1.bf16.msra.mxu0 %v2290_v16  ;;  %2236 = vmatprep.mubr.bf16.mxu1 %v2337_v26  ;;  %v2374_v16 = vld [vmem:[%s3369_s0 + $0x1cc] ss:$12 sps:$4 sm:$0xff]   ;;  %v2393_v26 = vld [vmem:[%s3369_s0 + $0x8] ss:$12 sps:$4 sm:$0xff]  }
  0x27   :  { %710 = vmatprep.subr.bf16.mxu0 %v2440_v0 }
  0x2a   :  { %711 = vmatpush1.bf16.msra.mxu0 %v2291_v19  ;;  %v2381_v19 = vld [vmem:[%s3369_s0 + $0x1e0] ss:$12 sps:$4 sm:$0xff]  }
  0x2b   :  { %712 = vmatprep.subr.bf16.mxu0 %v2440_v0 }
  0x2d   :  { %2237 = vmatmul.mubr.bf16.gmra.mrb[4].mxu1 %v2340_v28  ;;  %v2395_v28 = vld [vmem:[%s3369_s0 + $0x38] ss:$12 sps:$4 sm:$0xff]  }
  0x2e   :  { %713 = vmatpush1.bf16.msra.mxu0 %v2292_v21  ;;  %2240 = vmatprep.mubr.bf16.mxu1 %v2345_v30  ;;  %v2384_v21 = vld [vmem:[%s3369_s0 + $0x1f8] ss:$12 sps:$4 sm:$0xff]   ;;  %v2397_v30 = vld [vmem:[%s3369_s0 + $0x68] ss:$12 sps:$4 sm:$0xff]  }
  0x2f   :  { %714 = vmatprep.subr.bf16.mxu0 %v2440_v0 }
  0x32   :  { %715 = vmatpush1.bf16.msra.mxu0 %v2293_v23  ;;  %v2389_v23 = vld [vmem:[%s3369_s0 + $0x210] ss:$12 sps:$4 sm:$0xff]  }
  0x33   :  { %716 = vmatprep.subr.bf16.mxu0 %v2440_v0 }
  0x35   :  { %2241 = vmatmul.mubr.bf16.gmra.mrb[8].mxu1 %v2348_v33 }
  0x36   :  { %717 = vmatpush1.bf16.msra.mxu0 %v2294_v24  ;;  %2244 = vmatprep.mubr.bf16.mxu1 %v2353_v34  ;;  %v2390_v24 = vld [vmem:[%s3369_s0 + $0x22c] ss:$12 sps:$4 sm:$0xff]  }
  0x37   :  { %718 = vmatprep.subr.bf16.mxu0 %v2440_v0 }
  0x3a   :  { %719 = vmatpush1.bf16.msra.mxu0 %v2295_v27  ;;  %v2394_v27 = vld [vmem:[%s3369_s0 + $0x20] ss:$12 sps:$4 sm:$0xff]  }
  0x3b   :  { %720 = vmatprep.subr.bf16.mxu0 %v2440_v0 }
  0x3d   :  { %2245 = vmatmul.mubr.bf16.gmra.mrb[12].mxu1 %v2356_v37 }
  0x3e   :  { %721 = vmatpush1.bf16.msra.mxu0 %v2296_v29  ;;  %2248 = vmatprep.mubr.bf16.mxu1 %v2361_v38  ;;  %v2396_v29 = vld [vmem:[%s3369_s0 + $0x50] ss:$12 sps:$4 sm:$0xff]  }
  0x3f   :  { %2200 = vmatprep.subr.bf16.mxu0 %v2498_v8 }
  0x41   :  { %723 = vmatmul.mubr.bf16.vlgmr.msra.gmra.mrb[0].mxu0 %v2297_v31 }
  0x42   :  { %2201 = vmatpush3.bf16.msra.mxu0 %v2498_v8  ;;  %730 = vmatprep.mubr.bf16.mxu0 %v2301_v32  ;;  %v2358_v8 = vld [vmem:[%s3369_s0 + $0x16c] ss:$12 sps:$4 sm:$0xff]  }
  0x43   :  { %2202 = vmatprep.subr.bf16.mxu0 %v2510_v10 }
  0x45   :  { %2249 = vmatmul.mubr.bf16.gmra.mrb[16].mxu1 %v2364_v41 }
  0x46   :  { %2203 = vmatpush3.bf16.msra.mxu0 %v2510_v10  ;;  %2252 = vmatprep.mubr.bf16.mxu1 %v2369_v42  ;;  %v2362_v10 = vld [vmem:[%s3369_s0 + $0x184] ss:$12 sps:$4 sm:$0xff]  }
  0x47   :  { %2204 = vmatprep.subr.bf16.mxu0 %v2520_v12 }
  0x49   :  { %731 = vmatmul.mubr.bf16.gmra.mrb[4].mxu0 %v2303_v35  ;;  %v2398_v35 = vld [vmem:[%s3369_s0 + $0x80] ss:$12 sps:$4 sm:$0xff]  }
  0x4a   :  { %738 = vmatprep.mubr.bf16.mxu0 %v2304_v36  ;;  %2205 = vmatpush3.bf16.msra.mxu0 %v2520_v12  ;;  %v2366_v12 = vld [vmem:[%s3369_s0 + $0x19c] ss:$12 sps:$4 sm:$0xff]   ;;  %v2399_v36 = vld [vmem:[%s3369_s0 + $0x98] ss:$12 sps:$4 sm:$0xff]  }
  0x4b   :  { %2206 = vmatprep.subr.bf16.mxu0 %v2526_v13 }
  0x4d   :  { %2253 = vmatmul.mubr.bf16.gmra.mrb[20].mxu1 %v2372_v45 }
  0x4e   :  { %2207 = vmatpush3.bf16.msra.mxu0 %v2526_v13  ;;  %2256 = vmatprep.mubr.bf16.mxu1 %v2377_v46  ;;  %v2368_v13 = vld [vmem:[%s3369_s0 + $0x198] ss:$12 sps:$4 sm:$0xff]  }
  0x4f   :  { %2208 = vmatprep.subr.bf16.mxu0 %v2538_v15 }
  0x51   :  { %739 = vmatmul.mubr.bf16.gmra.mrb[8].mxu0 %v2306_v39 }
  0x52   :  { %746 = vmatprep.mubr.bf16.mxu0 %v2307_v40  ;;  %2209 = vmatpush3.bf16.msra.mxu0 %v2538_v15  ;;  %v2373_v15 = vld [vmem:[%s3369_s0 + $0x1b0] ss:$12 sps:$4 sm:$0xff]  }
  0x53   :  { %2210 = vmatprep.subr.bf16.mxu0 %v2547_v17 }
  0x55   :  { %2257 = vmatmul.mubr.bf16.gmra.mrb[24].mxu1 %v2380_v49 }
  0x56   :  { %2211 = vmatpush3.bf16.msra.mxu0 %v2547_v17  ;;  %2260 = vmatprep.mubr.bf16.mxu1 %v2385_v52  ;;  %v2376_v17 = vld [vmem:[%s3369_s0 + $0x1c8] ss:$12 sps:$4 sm:$0xff]  }
  0x57   :  { %2212 = vmatprep.subr.bf16.mxu0 %v2563_v20 }
  0x59   :  { %747 = vmatmul.mubr.bf16.gmra.mrb[12].mxu0 %v2309_v43  ;;  %v2400_v43 = vld [vmem:[%s3369_s0 + $0xb0] ss:$12 sps:$4 sm:$0xff]  }
  0x5a   :  { %754 = vmatprep.mubr.bf16.mxu0 %v2311_v44  ;;  %2213 = vmatpush3.bf16.msra.mxu0 %v2563_v20  ;;  %v2382_v20 = vld [vmem:[%s3369_s0 + $0x1fc] ss:$12 sps:$4 sm:$0xff]  }
  0x5b   :  { %2214 = vmatprep.subr.bf16.mxu0 %v2574_v22 }
  0x5d   :  { %2261 = vmatmul.mubr.bf16.gmra.mrb[28].mxu1 %v2388_v53 }
  0x5e   :  { %2215 = vmatpush3.bf16.msra.mxu0 %v2574_v22  ;;  %1331 = vmatprep.mubr.bf16.mxu1 %v2470_v1  ;;  %v2344_v1 = vld [vmem:[%s3369_s0 + $0x108] ss:$12 sps:$4 sm:$0xff]  }
  0x5f   :  { %v2386_v22 = vld [vmem:[%s3369_s0 + $0x214] ss:$12 sps:$4 sm:$0xff]  }
  0x61   :  { %755 = vmatmul.mubr.bf16.gmra.mrb[16].mxu0 %v2313_v47 }
  0x62   :  { %762 = vmatprep.mubr.bf16.mxu0 %v2314_v48 }
  0x69   :  { %763 = vmatmul.mubr.bf16.gmra.mrb[20].mxu0 %v2317_v50  ;;  %v2401_v50 = vld [vmem:[%s3370_s2] sm:$0xff]  }
  0x6a   :  { %770 = vmatprep.mubr.bf16.mxu0 %v2319_v51  ;;  %1300 = vmatpush1.bf16.msra.mxu1 %v2401_v50 }
  0x6b   :  { %1301 = vmatprep.subr.bf16.mxu1 %v2440_v0 }
  0x71   :  { %771 = vmatmul.mubr.bf16.gmra.mrb[24].mxu0 %v2322_v54 }
  0x72   :  { %778 = vmatprep.mubr.bf16.mxu0 %v2324_v55  ;;  %v2402_v55 = vld [vmem:[%s3370_s2 + $0x8] sm:$0xff]  }
  0x73   :  { %1302 = vmatpush1.bf16.msra.mxu1 %v2402_v55 }
  0x74   :  { %1303 = vmatprep.subr.bf16.mxu1 %v2440_v0 }
  0x79   :  { %779 = vmatmul.mubr.bf16.gmra.mrb[28].mxu0 %v2327_v56 }
  0x7a   :  { %786 = vmatprep.mubr.bf16.mxu0 %v2330_v57 }
  0x81   :  { %787 = vmatmul.mubr.bf16.gmra.mrb[32].mxu0 %v2333_v58 }
  0x82   :  { %794 = vmatprep.mubr.bf16.mxu0 %v2334_v59 }
  0x89   :  { %795 = vmatmul.mubr.bf16.gmra.mrb[36].mxu0 %v2336_v60  ;;  %v2403_v60 = vld [vmem:[%s3370_s2 + $0x10] sm:$0xff]  }
  0x8a   :  { %802 = vmatprep.mubr.bf16.mxu0 %v2338_v61  ;;  %1304 = vmatpush1.bf16.msra.mxu1 %v2403_v60 }
  0x8b   :  { %1305 = vmatprep.subr.bf16.mxu1 %v2440_v0 }
  0x91   :  { %803 = vmatmul.mubr.bf16.gmra.mrb[40].mxu0 %v2341_v62 }
  0x92   :  { %810 = vmatprep.mubr.bf16.mxu0 %v2342_v63 }
  0x99   :  { %811 = vmatmul.mubr.bf16.gmra.mrb[44].mxu0 %v2344_v1 }
  0x9a   :  { %818 = vmatprep.mubr.bf16.mxu0 %v2346_v2  ;;  %v2404_v2 = vld [vmem:[%s3370_s2 + $0x18] sm:$0xff]  }
  0x9b   :  { %1306 = vmatpush1.bf16.msra.mxu1 %v2404_v2  ;;  %v2413_v2 = vld [vmem:[%s3370_s2 + $0x60] sm:$0xff]  }
  0x9c   :  { %1307 = vmatprep.subr.bf16.mxu1 %v2440_v0 }
  0xa1   :  { %819 = vmatmul.mubr.bf16.gmra.mrb[48].mxu0 %v2349_v3 }
  0xa2   :  { %826 = vmatprep.mubr.bf16.mxu0 %v2350_v4 }
  0xa9   :  { %827 = vmatmul.mubr.bf16.gmra.mrb[52].mxu0 %v2352_v5 }
  0xaa   :  { %834 = vmatprep.mubr.bf16.mxu0 %v2354_v6 }
  0xb1   :  { %835 = vmatmul.mubr.bf16.gmra.mrb[56].mxu0 %v2357_v7  ;;  %v2405_v7 = vld [vmem:[%s3370_s2 + $0x20] sm:$0xff]  }
  0xb2   :  { %842 = vmatprep.mubr.bf16.mxu0 %v2358_v8  ;;  %1308 = vmatpush1.bf16.msra.mxu1 %v2405_v7 }
  0xb3   :  { %1309 = vmatprep.subr.bf16.mxu1 %v2440_v0 }
  0xb9   :  { %843 = vmatmul.mubr.bf16.gmra.mrb[60].mxu0 %v2360_v9 }
  0xba   :  { %850 = vmatprep.mubr.bf16.mxu0 %v2362_v10 }
  0xc1   :  { %851 = vmatmul.mubr.bf16.gmra.mrb[64].mxu0 %v2365_v11 }
  0xc2   :  { %858 = vmatprep.mubr.bf16.mxu0 %v2366_v12  ;;  %v2406_v12 = vld [vmem:[%s3370_s2 + $0x28] sm:$0xff]  }
  0xc3   :  { %1310 = vmatpush1.bf16.msra.mxu1 %v2406_v12 }
  0xc4   :  { %1311 = vmatprep.subr.bf16.mxu1 %v2440_v0 }
  0xc9   :  { %859 = vmatmul.mubr.bf16.gmra.mrb[68].mxu0 %v2368_v13 }
  0xca   :  { %866 = vmatprep.mubr.bf16.mxu0 %v2370_v14 }
  0xd1   :  { %867 = vmatmul.mubr.bf16.gmra.mrb[72].mxu0 %v2373_v15 }
  0xd2   :  { %874 = vmatprep.mubr.bf16.mxu0 %v2374_v16 }
  0xd9   :  { %875 = vmatmul.mubr.bf16.gmra.mrb[76].mxu0 %v2376_v17  ;;  %v2407_v17 = vld [vmem:[%s3370_s2 + $0x30] sm:$0xff]  }
  0xda   :  { %882 = vmatprep.mubr.bf16.mxu0 %v2378_v18  ;;  %1312 = vmatpush1.bf16.msra.mxu1 %v2407_v17  ;;  %v2414_v17 = vld [vmem:[%s3370_s2 + $0x68] sm:$0xff]  }
  0xdb   :  { %1313 = vmatprep.subr.bf16.mxu1 %v2440_v0 }
  0xe1   :  { %883 = vmatmul.mubr.bf16.gmra.mrb[80].mxu0 %v2381_v19 }
  0xe2   :  { %890 = vmatprep.mubr.bf16.mxu0 %v2382_v20 }
  0xe9   :  { %891 = vmatmul.mubr.bf16.gmra.mrb[84].mxu0 %v2384_v21 }
  0xea   :  { %898 = vmatprep.mubr.bf16.mxu0 %v2386_v22  ;;  %v2408_v22 = vld [vmem:[%s3370_s2 + $0x38] sm:$0xff]  }
  0xeb   :  { %1314 = vmatpush1.bf16.msra.mxu1 %v2408_v22 }
  0xec   :  { %1315 = vmatprep.subr.bf16.mxu1 %v2440_v0 }
  0xf1   :  { %899 = vmatmul.mubr.bf16.gmra.mrb[88].mxu0 %v2389_v23 }
  0xf2   :  { %906 = vmatprep.mubr.bf16.mxu0 %v2390_v24 }
  0xf8   :  { %v2814_v31 = vpop.f32.mrb[0].mxu1 }
  0xf9   :  { %907 = vmatmul.mubr.bf16.gmra.mrb[92].mxu0 %v2392_v25  ;;  %v2816_v32 = vpop.f32.mrb[1].mxu1 }
  0xfa   :  { %2216 = vmatprep.mubr.bf16.mxu0 %v2393_v26  ;;  %v2818_v33 = vpop.f32.mrb[2].mxu1 }
  0xfb   :  { %v2820_v34 = vpop.f32.mrb[3].mxu1 }
 0x100   :  { %v2828_v37 = vpop.f32.mrb[4].mxu1 }
 0x101   :  { %2217 = vmatmul.mubr.bf16.vlgmr.msra.gmra.mrb[96].mxu0 %v2394_v27  ;;  %v2830_v38 = vpop.f32.mrb[5].mxu1  ;;  %v2409_v27 = vld [vmem:[%s3370_s2 + $0x40] sm:$0xff]  }
 0x102   :  { %2220 = vmatprep.mubr.bf16.mxu0 %v2395_v28  ;;  %v2832_v39 = vpop.f32.mrb[6].mxu1  ;;  %1316 = vmatpush1.bf16.msra.mxu1 %v2409_v27 }
 0x103   :  { %v2834_v40 = vpop.f32.mrb[7].mxu1  ;;  %1317 = vmatprep.subr.bf16.mxu1 %v2440_v0 }
 0x108   :  { %v2843_v46 = vpop.f32.mrb[8].mxu1 }
 0x109   :  { %2221 = vmatmul.mubr.bf16.gmra.mrb[100].mxu0 %v2396_v29  ;;  %v2845_v47 = vpop.f32.mrb[9].mxu1 }
 0x10a   :  { %2224 = vmatprep.mubr.bf16.mxu0 %v2397_v30  ;;  %v2847_v48 = vpop.f32.mrb[10].mxu1 }
 0x10b   :  { %v2849_v49 = vpop.f32.mrb[11].mxu1 }
 0x110   :  { %v2862_v56 = vpop.f32.mrb[12].mxu1 }
 0x111   :  { %2225 = vmatmul.mubr.bf16.gmra.mrb[104].mxu0 %v2398_v35  ;;  %v2864_v57 = vpop.f32.mrb[13].mxu1 }
 0x112   :  { %2228 = vmatprep.mubr.bf16.mxu0 %v2399_v36  ;;  %v2866_v58 = vpop.f32.mrb[14].mxu1  ;;  %v2410_v36 = vld [vmem:[%s3370_s2 + $0x48] sm:$0xff]  }
 0x113   :  { %v2869_v59 = vpop.f32.mrb[15].mxu1  ;;  %1318 = vmatpush1.bf16.msra.mxu1 %v2410_v36 }
 0x114   :  { %v2836_v41 = vpop.f32.mrb[0].mxu0  ;;  %1319 = vmatprep.subr.bf16.mxu1 %v2440_v0 }
 0x115   :  { %v726_v42 = vpop.f32.mrb[1].mxu0 }
 0x116   :  { %v2841_v44 = vpop.f32.mrb[2].mxu0 }
 0x117   :  { %v729_v45 = vpop.f32.mrb[3].mxu0 }
 0x118   :  { %v2882_v3 = vpop.f32.mrb[16].mxu1 }
 0x119   :  { %2229 = vmatmul.mubr.bf16.gmra.mrb[108].mxu0 %v2400_v43  ;;  %v2884_v4 = vpop.f32.mrb[17].mxu1  ;;  %v2411_v43 = vld [vmem:[%s3370_s2 + $0x50] sm:$0xff]  }
 0x11a   :  { %v2886_v5 = vpop.f32.mrb[18].mxu1  ;;  %1320 = vmatpush1.bf16.msra.mxu1 %v2411_v43  ;;  %v2416_v43 = vld [vmem:[%s3370_s2 + $0x78] sm:$0xff]  }
 0x11b   :  { %v2889_v6 = vpop.f32.mrb[19].mxu1  ;;  %1321 = vmatprep.subr.bf16.mxu1 %v2440_v0 }
 0x11c   :  { %v2854_v51 = vpop.f32.mrb[4].mxu0 }
 0x11d   :  { %v734_v52 = vpop.f32.mrb[5].mxu0 }
 0x11e   :  { %v2856_v53 = vpop.f32.mrb[6].mxu0 }
 0x11f   :  { %v737_v54 = vpop.f32.mrb[7].mxu0 }
 0x120   :  { %v2902_v13 = vpop.f32.mrb[20].mxu1 }
 0x121   :  { %v2904_v14 = vpop.f32.mrb[21].mxu1 }
 0x122   :  { %v2906_v15 = vpop.f32.mrb[22].mxu1 }
 0x123   :  { %v2909_v16 = vpop.f32.mrb[23].mxu1 }
 0x124   :  { %v2874_v61 = vpop.f32.mrb[8].mxu0 }
 0x125   :  { %v742_v62 = vpop.f32.mrb[9].mxu0 }
 0x126   :  { %v2876_v63 = vpop.f32.mrb[10].mxu0 }
 0x127   :  { %v745_v1 = vpop.f32.mrb[11].mxu0 }
 0x128   :  { %v2922_v23 = vpop.f32.mrb[24].mxu1  ;;  %v2412_v1 = vld [vmem:[%s3370_s2 + $0x58] sm:$0xff]  }
 0x129   :  { %v2924_v24 = vpop.f32.mrb[25].mxu1  ;;  %1322 = vmatpush1.bf16.msra.mxu1 %v2412_v1 }
 0x12a   :  { %v2926_v25 = vpop.f32.mrb[26].mxu1  ;;  %1323 = vmatprep.subr.bf16.mxu1 %v2440_v0 }
 0x12b   :  { %v2929_v26 = vpop.f32.mrb[27].mxu1 }
 0x12c   :  { %v2894_v8 = vpop.f32.mrb[12].mxu0 }
 0x12d   :  { %v750_v9 = vpop.f32.mrb[13].mxu0  ;;  %1324 = vmatpush1.bf16.msra.mxu1 %v2413_v2 }
 0x12e   :  { %v2896_v10 = vpop.f32.mrb[14].mxu0  ;;  %1325 = vmatprep.subr.bf16.mxu1 %v2440_v0 }
 0x12f   :  { %v753_v11 = vpop.f32.mrb[15].mxu0 }
 0x130   :  { %v2942_v42 = vpop.f32.mrb[28].mxu1 }
 0x131   :  { %v2950_v50 = vpop.f32.mrb[29].mxu1  ;;  %1326 = vmatpush1.bf16.msra.mxu1 %v2414_v17 }
 0x132   :  { %v2952_v54 = vpop.f32.mrb[30].mxu1  ;;  %1327 = vmatprep.subr.bf16.mxu1 %v2440_v0 }
 0x133   :  { %v2956_v60 = vpop.f32.mrb[31].mxu1 }
 0x134   :  { %v2914_v18 = vpop.f32.mrb[16].mxu0 }
 0x135   :  { %v758_v19 = vpop.f32.mrb[17].mxu0 }
 0x136   :  { %v2916_v20 = vpop.f32.mrb[18].mxu0  ;;  %v2415_v19 = vld [vmem:[%s3370_s2 + $0x70] sm:$0xff]  }
 0x137   :  { %v761_v21 = vpop.f32.mrb[19].mxu0  ;;  %1328 = vmatpush1.bf16.msra.mxu1 %v2415_v19 }
 0x138   :  { %1329 = vmatprep.subr.bf16.mxu1 %v2440_v0 }
 0x13b   :  { %1330 = vmatpush1.bf16.msra.mxu1 %v2416_v43 }
 0x13c   :  { %v2934_v28 = vpop.f32.mrb[20].mxu0 }
 0x13d   :  { %v766_v29 = vpop.f32.mrb[21].mxu0 }
 0x13e   :  { %v2936_v30 = vpop.f32.mrb[22].mxu0 }
 0x13f   :  { %v769_v35 = vpop.f32.mrb[23].mxu0 }
 0x144   :  { %v2948_v45 = vpop.f32.mrb[24].mxu0 }
 0x145   :  { %v774_v52 = vpop.f32.mrb[25].mxu0 }
 0x146   :  { %v2954_v55 = vpop.f32.mrb[26].mxu0 }
 0x147   :  { %v777_v62 = vpop.f32.mrb[27].mxu0 }
 0x14c   :  { %v2966_v7 = vpop.f32.mrb[28].mxu0 }
 0x14d   :  { %v782_v9 = vpop.f32.mrb[29].mxu0 }
 0x14e   :  { %v2968_v11 = vpop.f32.mrb[30].mxu0 }
 0x14f   :  { %v785_v12 = vpop.f32.mrb[31].mxu0 }
 0x154   :  { %v788_v21 = vpop.f32.mrb[32].mxu0 }
 0x155   :  { %v2979_v22 = vadd.f32 %v2816_v32, %v788_v21  ;;  %v790_v27 = vpop.f32.mrb[33].mxu0 }
 0x156   :  { %v791_v29 = vpop.f32.mrb[34].mxu0 }
 0x157   :  { %v2983_v35 = vadd.f32 %v2820_v34, %v791_v29  ;;  %v793_v36 = vpop.f32.mrb[35].mxu0 }
 0x159   :  { %v1148_v52 = vpack.c.bf16 %v2983_v35, %v2979_v22  ;;  %v2427_v22 = vld [vmem:[%s3368_s1 + $0x58] sm:$0xff]  }
 0x15c   :  { %v796_v62 = vpop.f32.mrb[36].mxu0 }
 0x15d   :  { %v2991_v32 = vadd.f32 %v2814_v31, %v796_v62  ;;  %v798_v1 = vpop.f32.mrb[37].mxu0 }
 0x15e   :  { %v799_v2 = vpop.f32.mrb[38].mxu0 }
 0x15f   :  { %v2994_v0 = vadd.f32 %v2818_v33, %v799_v2  ;;  %v801_v34 = vpop.f32.mrb[39].mxu0 }
 0x161   :  { %v1149_v9 = vpack.c.bf16 %v2994_v0, %v2991_v32  ;;  %v2429_v0 = vld [vmem:[%s3368_s1 + $0x68] sm:$0xff]  }
 0x164   :  { %v804_v12 = vpop.f32.mrb[40].mxu0 }
 0x165   :  { %v2999_v17 = vadd.f32 %v2830_v38, %v804_v12  ;;  %v806_v19 = vpop.f32.mrb[41].mxu0 }
 0x166   :  { %v807_v21 = vpop.f32.mrb[42].mxu0 }
 0x167   :  { %v3002_v27 = vadd.f32 %v2834_v40, %v807_v21  ;;  %v809_v31 = vpop.f32.mrb[43].mxu0 }
 0x16c   :  { %v812_v36 = vpop.f32.mrb[44].mxu0 }
 0x16d   :  { %v3007_v33 = vadd.f32 %v2828_v37, %v812_v36  ;;  %v814_v43 = vpop.f32.mrb[45].mxu0 }
 0x16e   :  { %v815_v62 = vpop.f32.mrb[46].mxu0 }
 0x16f   :  { %v3010_v1 = vadd.f32 %v2832_v39, %v815_v62  ;;  %v817_v38 = vpop.f32.mrb[47].mxu0 }
 0x171   :  { %v3374_v35 = vpack.c.bf16 %v3010_v1, %v3007_v33  ;;  %v2431_v33 = vld [vmem:[%s3368_s1 + $0x78] sm:$0xff]  }
 0x174   :  { %v820_v34 = vpop.f32.mrb[48].mxu0 }
 0x175   :  { %v3015_v40 = vadd.f32 %v2845_v47, %v820_v34  ;;  %v822_v12 = vpop.f32.mrb[49].mxu0 }
 0x176   :  { %v823_v19 = vpop.f32.mrb[50].mxu0 }
 0x177   :  { %v3018_v21 = vadd.f32 %v2849_v49, %v823_v19  ;;  %v825_v37 = vpop.f32.mrb[51].mxu0 }
 0x179   :  { %v3375_v32 = vpack.c.bf16 %v3018_v21, %v3015_v40  ;;  %v2432_v40 = vld [vmem:[%s3368_s1 + $0x80] sm:$0xff]  }
 0x17c   :  { %v828_v36 = vpop.f32.mrb[52].mxu0 }
 0x17d   :  { %v3023_v39 = vadd.f32 %v2843_v46, %v828_v36  ;;  %v830_v43 = vpop.f32.mrb[53].mxu0 }
 0x17e   :  { %v831_v62 = vpop.f32.mrb[54].mxu0 }
 0x17f   :  { %v3026_v38 = vadd.f32 %v2847_v48, %v831_v62  ;;  %v833_v47 = vpop.f32.mrb[55].mxu0 }
 0x184   :  { %v836_v12 = vpop.f32.mrb[56].mxu0 }
 0x185   :  { %v3031_v49 = vadd.f32 %v2864_v57, %v836_v12  ;;  %v838_v19 = vpop.f32.mrb[57].mxu0 }
 0x186   :  { %v839_v37 = vpop.f32.mrb[58].mxu0 }
 0x187   :  { %v3034_v31 = vadd.f32 %v2869_v59, %v839_v37  ;;  %v841_v46 = vpop.f32.mrb[59].mxu0 }
 0x18c   :  { %v844_v43 = vpop.f32.mrb[60].mxu0 }
 0x18d   :  { %v3039_v48 = vadd.f32 %v2862_v56, %v844_v43  ;;  %v846_v62 = vpop.f32.mrb[61].mxu0 }
 0x18e   :  { %v847_v47 = vpop.f32.mrb[62].mxu0 }
 0x18f   :  { %v3042_v34 = vadd.f32 %v2866_v58, %v847_v47  ;;  %v849_v57 = vpop.f32.mrb[63].mxu0 }
 0x191   :  { %v3378_v1 = vpack.c.bf16 %v3042_v34, %v3039_v48  ;;  %v2436_v48 = vld [vmem:[%s3368_s1 + $0xa0] sm:$0xff]  }
 0x194   :  { %v852_v19 = vpop.f32.mrb[64].mxu0 }
 0x195   :  { %v3047_v59 = vadd.f32 %v2884_v4, %v852_v19  ;;  %v854_v37 = vpop.f32.mrb[65].mxu0 }
 0x196   :  { %v855_v46 = vpop.f32.mrb[66].mxu0 }
 0x197   :  { %v3050_v36 = vadd.f32 %v2889_v6, %v855_v46  ;;  %v857_v56 = vpop.f32.mrb[67].mxu0 }
 0x199   :  { %v3379_v21 = vpack.c.bf16 %v3050_v36, %v3047_v59  ;;  %v2437_v59 = vld [vmem:[%s3368_s1 + $0xa8] sm:$0xff]  }
 0x19c   :  { %v860_v62 = vpop.f32.mrb[68].mxu0 }
 0x19d   :  { %v3055_v58 = vadd.f32 %v2882_v3, %v860_v62  ;;  %v862_v47 = vpop.f32.mrb[69].mxu0 }
 0x19e   :  { %v863_v57 = vpop.f32.mrb[70].mxu0 }
 0x19f   :  { %v3058_v12 = vadd.f32 %v2886_v5, %v863_v57  ;;  %v865_v4 = vpop.f32.mrb[71].mxu0 }
 0x1a4   :  { %v868_v37 = vpop.f32.mrb[72].mxu0 }
 0x1a5   :  { %v3063_v6 = vadd.f32 %v2904_v14, %v868_v37  ;;  %v870_v46 = vpop.f32.mrb[73].mxu0 }
 0x1a6   :  { %v871_v56 = vpop.f32.mrb[74].mxu0 }
 0x1a7   :  { %v3066_v43 = vadd.f32 %v2909_v16, %v871_v56  ;;  %v873_v3 = vpop.f32.mrb[75].mxu0 }
 0x1a9   :  { %v3381_v34 = vpack.c.bf16 %v3066_v43, %v3063_v6  ;;  %v2439_v6 = vld [vmem:[%s3368_s1 + $0xb8] sm:$0xff]  }
 0x1ac   :  { %v876_v47 = vpop.f32.mrb[76].mxu0 }
 0x1ad   :  { %v3071_v5 = vadd.f32 %v2902_v13, %v876_v47  ;;  %v878_v57 = vpop.f32.mrb[77].mxu0 }
 0x1ae   :  { %v879_v4 = vpop.f32.mrb[78].mxu0 }
 0x1af   :  { %v3074_v19 = vadd.f32 %v2906_v15, %v879_v4  ;;  %v881_v14 = vpop.f32.mrb[79].mxu0 }
 0x1b1   :  { %v3382_v36 = vpack.c.bf16 %v3074_v19, %v3071_v5 }
 0x1b4   :  { %v884_v46 = vpop.f32.mrb[80].mxu0 }
 0x1b5   :  { %v3079_v16 = vadd.f32 %v2924_v24, %v884_v46  ;;  %v886_v56 = vpop.f32.mrb[81].mxu0 }
 0x1b6   :  { %v887_v3 = vpop.f32.mrb[82].mxu0 }
 0x1b7   :  { %v3082_v62 = vadd.f32 %v2929_v26, %v887_v3  ;;  %v889_v13 = vpop.f32.mrb[83].mxu0 }
 0x1bc   :  { %v892_v57 = vpop.f32.mrb[84].mxu0 }
 0x1bd   :  { %v3087_v15 = vadd.f32 %v2922_v23, %v892_v57  ;;  %v894_v4 = vpop.f32.mrb[85].mxu0 }
 0x1be   :  { %v895_v14 = vpop.f32.mrb[86].mxu0 }
 0x1bf   :  { %v3090_v37 = vadd.f32 %v2926_v25, %v895_v14  ;;  %v897_v24 = vpop.f32.mrb[87].mxu0 }
 0x1c1   :  { %v3384_v43 = vpack.c.bf16 %v3090_v37, %v3087_v15 }
 0x1c4   :  { %v900_v56 = vpop.f32.mrb[88].mxu0 }
 0x1c5   :  { %v3095_v26 = vadd.f32 %v2950_v50, %v900_v56  ;;  %v902_v3 = vpop.f32.mrb[89].mxu0 }
 0x1c6   :  { %v903_v13 = vpop.f32.mrb[90].mxu0 }
 0x1c7   :  { %v3098_v47 = vadd.f32 %v2956_v60, %v903_v13  ;;  %v905_v23 = vpop.f32.mrb[91].mxu0 }
 0x1c9   :  { %v3385_v19 = vpack.c.bf16 %v3098_v47, %v3095_v26 }
 0x1cc   :  { %v908_v4 = vpop.f32.mrb[92].mxu0 }
 0x1cd   :  { %v3103_v25 = vadd.f32 %v2942_v42, %v908_v4  ;;  %v910_v14 = vpop.f32.mrb[93].mxu0 }
 0x1ce   :  { %v911_v24 = vpop.f32.mrb[94].mxu0 }
 0x1cf   :  { %v3106_v46 = vadd.f32 %v2952_v54, %v911_v24  ;;  %v913_v50 = vpop.f32.mrb[95].mxu0 }
 0x1d1   :  { %v1163_v56 = vpack.c.bf16 %v3106_v46, %v3103_v25 }
 0x1d4   :  { %v2218_v3 = vpop.f32.mrb[96].mxu0 }
 0x1d5   :  { %v958_v60 = vadd.f32 %v2218_v3, %v2854_v51  ;;  %v949_v13 = vpop.f32.mrb[97].mxu0  ;;  %v2417_v51 = vld [vmem:[%s3368_s1 + $0x8] sm:$0xff]  }
 0x1d6   :  { %v950_v23 = vadd.f32 %v949_v13, %v2836_v41  ;;  %v2219_v57 = vpop.f32.mrb[98].mxu0 }
 0x1d7   :  { %v961_v2 = vadd.f32 %v2219_v57, %v2856_v53  ;;  %v952_v42 = vpop.f32.mrb[99].mxu0 }
 0x1d8   :  { %v953_v4 = vadd.f32 %v952_v42, %v2841_v44 }
 0x1d9   :  { %v1141_v14 = vpack.c.bf16 %v961_v2, %v958_v60 }
 0x1da   :  { %v1140_v29 = vpack.c.bf16 %v953_v4, %v950_v23  ;;  %v2418_v23 = vld [vmem:[%s3368_s1 + $0x10] sm:$0xff]  }
 0x1dc   :  { %v2222_v54 = vpop.f32.mrb[100].mxu0  ;;  %1332 = vmatmul.mubr.bf16.vlgmr.msra.gmra.mrb[32].mxu1 %v1140_v29 }
 0x1dd   :  { %v974_v24 = vadd.f32 %v2222_v54, %v2894_v8  ;;  %v965_v50 = vpop.f32.mrb[101].mxu0  ;;  %1339 = vmatprep.mubr.bf16.mxu1 %v2417_v51  ;;  %v2419_v51 = vld [vmem:[%s3368_s1 + $0x18] sm:$0xff]  }
 0x1de   :  { %v966_v41 = vadd.f32 %v965_v50, %v2874_v61  ;;  %v2223_v3 = vpop.f32.mrb[102].mxu0 }
 0x1df   :  { %v977_v53 = vadd.f32 %v2223_v3, %v2896_v10  ;;  %v968_v57 = vpop.f32.mrb[103].mxu0 }
 0x1e0   :  { %v969_v44 = vadd.f32 %v968_v57, %v2876_v63 }
 0x1e1   :  { %v1143_v2 = vpack.c.bf16 %v977_v53, %v974_v24 }
 0x1e2   :  { %v1142_v60 = vpack.c.bf16 %v969_v44, %v966_v41  ;;  %v2421_v44 = vld [vmem:[%s3368_s1 + $0x28] sm:$0xff]  }
 0x1e4   :  { %v2226_v13 = vpop.f32.mrb[104].mxu0  ;;  %1340 = vmatmul.mubr.bf16.gmra.mrb[36].mxu1 %v1141_v14 }
 0x1e5   :  { %v990_v8 = vadd.f32 %v2226_v13, %v2934_v28  ;;  %v981_v29 = vpop.f32.mrb[105].mxu0  ;;  %1347 = vmatprep.mubr.bf16.mxu1 %v2418_v23  ;;  %v3373_v13 = vpack.c.bf16 %v3002_v27, %v2999_v17  ;;  %v2430_v17 = vld [vmem:[%s3368_s1 + $0x70] sm:$0xff]   ;;  %v3377_v27 = vpack.c.bf16 %v3034_v31, %v3031_v49  ;;  %v2433_v31 = vld [vmem:[%s3368_s1 + $0x88] sm:$0xff]   ;;  %v2435_v49 = vld [vmem:[%s3368_s1 + $0x98] sm:$0xff]  }
 0x1e6   :  { %v982_v61 = vadd.f32 %v981_v29, %v2914_v18  ;;  %v2227_v42 = vpop.f32.mrb[106].mxu0 }
 0x1e7   :  { %v993_v10 = vadd.f32 %v2227_v42, %v2936_v30  ;;  %v984_v4 = vpop.f32.mrb[107].mxu0 }
 0x1e8   :  { %v985_v63 = vadd.f32 %v984_v4, %v2916_v20 }
 0x1e9   :  { %v1145_v54 = vpack.c.bf16 %v993_v10, %v990_v8 }
 0x1ea   :  { %v1144_v24 = vpack.c.bf16 %v985_v63, %v982_v61 }
 0x1ec   :  { %v2230_v50 = vpop.f32.mrb[108].mxu0  ;;  %1348 = vmatmul.mubr.bf16.gmra.mrb[40].mxu1 %v1142_v60  ;;  %v2426_v60 = vld [vmem:[%s3368_s1 + $0x50] sm:$0xff]  }
 0x1ed   :  { %v1006_v28 = vadd.f32 %v2230_v50, %v2966_v7  ;;  %v997_v14 = vpop.f32.mrb[109].mxu0  ;;  %1355 = vmatprep.mubr.bf16.mxu1 %v2419_v51  ;;  %v2420_v7 = vld [vmem:[%s3368_s1 + $0x20] sm:$0xff]  }
 0x1ee   :  { %v998_v18 = vadd.f32 %v997_v14, %v2948_v45  ;;  %v2231_v41 = vpop.f32.mrb[110].mxu0  ;;  %v2422_v45 = vld [vmem:[%s3368_s1 + $0x30] sm:$0xff]  }
 0x1ef   :  { %v1009_v30 = vadd.f32 %v2231_v41, %v2968_v11  ;;  %v1000_v3 = vpop.f32.mrb[111].mxu0  ;;  %v2424_v11 = vld [vmem:[%s3368_s1 + $0x40] sm:$0xff]  }
 0x1f0   :  { %v1001_v20 = vadd.f32 %v1000_v3, %v2954_v55  ;;  %v2423_v55 = vld [vmem:[%s3368_s1 + $0x38] sm:$0xff]  }
 0x1f1   :  { %v1147_v53 = vpack.c.bf16 %v1009_v30, %v1006_v28 }
 0x1f2   :  { %v1146_v57 = vpack.c.bf16 %v1001_v20, %v998_v18 }
 0x1f4   :  { %1356 = vmatmul.mubr.bf16.gmra.mrb[44].mxu1 %v1143_v2  ;;  %v2425_v2 = vld [vmem:[%s3368_s1 + $0x48] sm:$0xff]  }
 0x1f5   :  { %1363 = vmatprep.mubr.bf16.mxu1 %v2420_v7 }
 0x1fc   :  { %1364 = vmatmul.mubr.bf16.gmra.mrb[48].mxu1 %v1144_v24 }
 0x1fd   :  { %1371 = vmatprep.mubr.bf16.mxu1 %v2421_v44 }
 0x204   :  { %1372 = vmatmul.mubr.bf16.gmra.mrb[52].mxu1 %v1145_v54 }
 0x205   :  { %1379 = vmatprep.mubr.bf16.mxu1 %v2422_v45 }
 0x20c   :  { %1380 = vmatmul.mubr.bf16.gmra.mrb[56].mxu1 %v1146_v57 }
 0x20d   :  { %1387 = vmatprep.mubr.bf16.mxu1 %v2423_v55 }
 0x214   :  { %1388 = vmatmul.mubr.bf16.gmra.mrb[60].mxu1 %v1147_v53 }
 0x215   :  { %1395 = vmatprep.mubr.bf16.mxu1 %v2424_v11 }
 0x21c   :  { %1396 = vmatmul.mubr.bf16.gmra.mrb[64].mxu1 %v1148_v52  ;;  %v2428_v52 = vld [vmem:[%s3368_s1 + $0x60] sm:$0xff]  }
 0x21d   :  { %1403 = vmatprep.mubr.bf16.mxu1 %v2425_v2 }
 0x224   :  { %1404 = vmatmul.mubr.bf16.gmra.mrb[68].mxu1 %v1149_v9  ;;  %v3376_v9 = vpack.c.bf16 %v3026_v38, %v3023_v39  ;;  %v3380_v39 = vpack.c.bf16 %v3058_v12, %v3055_v58  ;;  %v2434_v38 = vld [vmem:[%s3368_s1 + $0x90] sm:$0xff]   ;;  %v3383_v12 = vpack.c.bf16 %v3082_v62, %v3079_v16  ;;  %v3246_v62 = vld [vmem:[%s3371_s3] ss:$0 sm:$0xff] }
 0x225   :  { %1411 = vmatprep.mubr.bf16.mxu1 %v2426_v60  ;;  %v2438_v58 = vld [vmem:[%s3368_s1 + $0xb0] sm:$0xff]  }
 0x22c   :  { %1412 = vmatmul.mubr.bf16.gmra.mrb[72].mxu1 %v3373_v13 }
 0x22d   :  { %1419 = vmatprep.mubr.bf16.mxu1 %v2427_v22 }
 0x234   :  { %1420 = vmatmul.mubr.bf16.gmra.mrb[76].mxu1 %v3374_v35 }
 0x235   :  { %1427 = vmatprep.mubr.bf16.mxu1 %v2428_v52 }
 0x23c   :  { %1428 = vmatmul.mubr.bf16.gmra.mrb[80].mxu1 %v3375_v32 }
 0x23d   :  { %1435 = vmatprep.mubr.bf16.mxu1 %v2429_v0 }
 0x244   :  { %1436 = vmatmul.mubr.bf16.gmra.mrb[84].mxu1 %v3376_v9 }
 0x245   :  { %1443 = vmatprep.mubr.bf16.mxu1 %v2430_v17 }
 0x24c   :  { %1444 = vmatmul.mubr.bf16.gmra.mrb[88].mxu1 %v3377_v27 }
 0x24d   :  { %1451 = vmatprep.mubr.bf16.mxu1 %v2431_v33 }
 0x254   :  { %1452 = vmatmul.mubr.bf16.gmra.mrb[92].mxu1 %v3378_v1 }
 0x255   :  { %1459 = vmatprep.mubr.bf16.mxu1 %v2432_v40 }
 0x25c   :  { %1460 = vmatmul.mubr.bf16.gmra.mrb[96].mxu1 %v3379_v21 }
 0x25d   :  { %1467 = vmatprep.mubr.bf16.mxu1 %v2433_v31 }
 0x264   :  { %1468 = vmatmul.mubr.bf16.gmra.mrb[100].mxu1 %v3380_v39 }
 0x265   :  { %1475 = vmatprep.mubr.bf16.mxu1 %v2434_v38 }
 0x26c   :  { %1476 = vmatmul.mubr.bf16.gmra.mrb[104].mxu1 %v3381_v34 }
 0x26d   :  { %1483 = vmatprep.mubr.bf16.mxu1 %v2435_v49 }
 0x274   :  { %1484 = vmatmul.mubr.bf16.gmra.mrb[108].mxu1 %v3382_v36 }
 0x275   :  { %1491 = vmatprep.mubr.bf16.mxu1 %v2436_v48 }
 0x27c   :  { %1492 = vmatmul.mubr.bf16.gmra.mrb[112].mxu1 %v3383_v12 }
 0x27d   :  { %1499 = vmatprep.mubr.bf16.mxu1 %v2437_v59 }
 0x284   :  { %1500 = vmatmul.mubr.bf16.gmra.mrb[116].mxu1 %v3384_v43 }
 0x285   :  { %1507 = vmatprep.mubr.bf16.mxu1 %v2438_v58 }
 0x28c   :  { %1508 = vmatmul.mubr.bf16.gmra.mrb[120].mxu1 %v3385_v19 }
 0x28d   :  { %1515 = vmatprep.mubr.bf16.mxu1 %v2439_v6 }
 0x294   :  { %1516 = vmatmul.mubr.bf16.gmra.mrb[124].mxu1 %v1163_v56 }
 0x2af   :  { %v1333_v5 = vpop.f32.mrb[32].mxu1 }
 0x2b0   :  { %v1334_v37 = vadd.f32 %v3246_v62, %v1333_v5  ;;  %v1335_v16 = vpop.f32.mrb[33].mxu1 }
 0x2b1   :  { %v1336_v47 = vpop.f32.mrb[34].mxu1 }
 0x2b2   :  { %v1337_v15 = vadd.f32 %v3246_v62, %v1336_v47  ;;  %v1338_v26 = vpop.f32.mrb[35].mxu1  ;;  %v1524_v8 = vmax.f32 %v1334_v37, 0.0 }
 0x2b4   :  { %v1525_v29 = vmax.f32 %v1337_v15, 0.0 }
 0x2b6   :  { %v2028_v23 = vpack.c.bf16 %v1525_v29, %v1524_v8 }
 0x2b7   :  { %v1341_v61 = vpop.f32.mrb[36].mxu1 }
 0x2b8   :  { %2029 = vst [vmem:[%s3372_s4] sm:$0xff] %v2028_v23   ;;  %v1342_v46 = vadd.f32 %v3246_v62, %v1341_v61  ;;  %v1343_v25 = vpop.f32.mrb[37].mxu1 }
 0x2b9   :  { %v1344_v56 = vpop.f32.mrb[38].mxu1 }
 0x2ba   :  { %v1345_v42 = vadd.f32 %v3246_v62, %v1344_v56  ;;  %v1346_v10 = vpop.f32.mrb[39].mxu1  ;;  %v1526_v4 = vmax.f32 %v1342_v46, 0.0 }
 0x2bc   :  { %v1527_v63 = vmax.f32 %v1345_v42, 0.0 }
 0x2be   :  { %v2033_v54 = vpack.c.bf16 %v1527_v63, %v1526_v4 }
 0x2bf   :  { %v1349_v24 = vpop.f32.mrb[40].mxu1 }
 0x2c0   :  { %2145 = vst [vmem:[%s3372_s4 + $0x8] sm:$0xff] %v2033_v54   ;;  %v1350_v50 = vadd.f32 %v3246_v62, %v1349_v24  ;;  %v1351_v28 = vpop.f32.mrb[41].mxu1 }
 0x2c1   :  { %v1352_v14 = vpop.f32.mrb[42].mxu1 }
 0x2c2   :  { %v1353_v51 = vadd.f32 %v3246_v62, %v1352_v14  ;;  %v1354_v18 = vpop.f32.mrb[43].mxu1  ;;  %v1528_v41 = vmax.f32 %v1350_v50, 0.0 }
 0x2c4   :  { %v1529_v30 = vmax.f32 %v1353_v51, 0.0 }
 0x2c6   :  { %v2038_v3 = vpack.c.bf16 %v1529_v30, %v1528_v41 }
 0x2c7   :  { %v1357_v20 = vpop.f32.mrb[44].mxu1 }
 0x2c8   :  { %2146 = vst [vmem:[%s3372_s4 + $0x10] sm:$0xff] %v2038_v3   ;;  %v1358_v53 = vadd.f32 %v3246_v62, %v1357_v20  ;;  %v1359_v57 = vpop.f32.mrb[45].mxu1 }
 0x2c9   :  { %v1360_v7 = vpop.f32.mrb[46].mxu1 }
 0x2ca   :  { %v1361_v44 = vadd.f32 %v3246_v62, %v1360_v7  ;;  %v1362_v45 = vpop.f32.mrb[47].mxu1  ;;  %v1530_v55 = vmax.f32 %v1358_v53, 0.0 }
 0x2cc   :  { %v1531_v11 = vmax.f32 %v1361_v44, 0.0 }
 0x2ce   :  { %v2043_v2 = vpack.c.bf16 %v1531_v11, %v1530_v55 }
 0x2cf   :  { %v1365_v60 = vpop.f32.mrb[48].mxu1 }
 0x2d0   :  { %2147 = vst [vmem:[%s3372_s4 + $0x18] sm:$0xff] %v2043_v2   ;;  %v1366_v13 = vadd.f32 %v3246_v62, %v1365_v60  ;;  %v1367_v22 = vpop.f32.mrb[49].mxu1 }
 0x2d1   :  { %v1368_v35 = vpop.f32.mrb[50].mxu1 }
 0x2d2   :  { %v1369_v52 = vadd.f32 %v3246_v62, %v1368_v35  ;;  %v1370_v32 = vpop.f32.mrb[51].mxu1  ;;  %v1532_v0 = vmax.f32 %v1366_v13, 0.0 }
 0x2d4   :  { %v1533_v9 = vmax.f32 %v1369_v52, 0.0 }
 0x2d6   :  { %v2048_v17 = vpack.c.bf16 %v1533_v9, %v1532_v0 }
 0x2d7   :  { %v1373_v27 = vpop.f32.mrb[52].mxu1 }
 0x2d8   :  { %2148 = vst [vmem:[%s3372_s4 + $0x20] sm:$0xff] %v2048_v17   ;;  %v1374_v33 = vadd.f32 %v3246_v62, %v1373_v27  ;;  %v1375_v1 = vpop.f32.mrb[53].mxu1 }
 0x2d9   :  { %v1376_v40 = vpop.f32.mrb[54].mxu1 }
 0x2da   :  { %v1377_v21 = vadd.f32 %v3246_v62, %v1376_v40  ;;  %v1378_v31 = vpop.f32.mrb[55].mxu1  ;;  %v1534_v39 = vmax.f32 %v1374_v33, 0.0 }
 0x2dc   :  { %v1535_v38 = vmax.f32 %v1377_v21, 0.0 }
 0x2de   :  { %v2053_v34 = vpack.c.bf16 %v1535_v38, %v1534_v39 }
 0x2df   :  { %v1381_v49 = vpop.f32.mrb[56].mxu1 }
 0x2e0   :  { %2149 = vst [vmem:[%s3372_s4 + $0x28] sm:$0xff] %v2053_v34   ;;  %v1382_v36 = vadd.f32 %v3246_v62, %v1381_v49  ;;  %v1383_v48 = vpop.f32.mrb[57].mxu1 }
 0x2e1   :  { %v1384_v12 = vpop.f32.mrb[58].mxu1 }
 0x2e2   :  { %v1385_v59 = vadd.f32 %v3246_v62, %v1384_v12  ;;  %v1386_v43 = vpop.f32.mrb[59].mxu1  ;;  %v1536_v58 = vmax.f32 %v1382_v36, 0.0 }
 0x2e4   :  { %v1537_v19 = vmax.f32 %v1385_v59, 0.0 }
 0x2e6   :  { %v2058_v6 = vpack.c.bf16 %v1537_v19, %v1536_v58 }
 0x2e7   :  { %v1389_v5 = vpop.f32.mrb[60].mxu1 }
 0x2e8   :  { %2150 = vst [vmem:[%s3372_s4 + $0x30] sm:$0xff] %v2058_v6   ;;  %v1390_v37 = vadd.f32 %v3246_v62, %v1389_v5  ;;  %v1391_v16 = vpop.f32.mrb[61].mxu1 }
 0x2e9   :  { %v1392_v47 = vpop.f32.mrb[62].mxu1 }
 0x2ea   :  { %v1393_v15 = vadd.f32 %v3246_v62, %v1392_v47  ;;  %v1394_v26 = vpop.f32.mrb[63].mxu1  ;;  %v1538_v8 = vmax.f32 %v1390_v37, 0.0 }
 0x2ec   :  { %v1539_v29 = vmax.f32 %v1393_v15, 0.0 }
 0x2ee   :  { %v2063_v23 = vpack.c.bf16 %v1539_v29, %v1538_v8 }
 0x2ef   :  { %v1397_v61 = vpop.f32.mrb[64].mxu1 }
 0x2f0   :  { %2151 = vst [vmem:[%s3372_s4 + $0x38] sm:$0xff] %v2063_v23   ;;  %v1398_v46 = vadd.f32 %v3246_v62, %v1397_v61  ;;  %v1399_v25 = vpop.f32.mrb[65].mxu1 }
 0x2f1   :  { %v1400_v56 = vpop.f32.mrb[66].mxu1 }
 0x2f2   :  { %v1401_v42 = vadd.f32 %v3246_v62, %v1400_v56  ;;  %v1402_v10 = vpop.f32.mrb[67].mxu1  ;;  %v1540_v4 = vmax.f32 %v1398_v46, 0.0 }
 0x2f4   :  { %v1541_v63 = vmax.f32 %v1401_v42, 0.0 }
 0x2f6   :  { %v2068_v54 = vpack.c.bf16 %v1541_v63, %v1540_v4 }
 0x2f7   :  { %v1405_v24 = vpop.f32.mrb[68].mxu1 }
 0x2f8   :  { %2152 = vst [vmem:[%s3372_s4 + $0x40] sm:$0xff] %v2068_v54   ;;  %v1406_v50 = vadd.f32 %v3246_v62, %v1405_v24  ;;  %v1407_v28 = vpop.f32.mrb[69].mxu1 }
 0x2f9   :  { %v1408_v14 = vpop.f32.mrb[70].mxu1 }
 0x2fa   :  { %v1409_v51 = vadd.f32 %v3246_v62, %v1408_v14  ;;  %v1410_v18 = vpop.f32.mrb[71].mxu1  ;;  %v1542_v41 = vmax.f32 %v1406_v50, 0.0 }
 0x2fc   :  { %v1543_v30 = vmax.f32 %v1409_v51, 0.0 }
 0x2fe   :  { %v2073_v3 = vpack.c.bf16 %v1543_v30, %v1542_v41 }
 0x2ff   :  { %v1413_v20 = vpop.f32.mrb[72].mxu1 }
 0x300   :  { %2153 = vst [vmem:[%s3372_s4 + $0x48] sm:$0xff] %v2073_v3   ;;  %v1414_v53 = vadd.f32 %v3246_v62, %v1413_v20  ;;  %v1415_v57 = vpop.f32.mrb[73].mxu1 }
 0x301   :  { %v1416_v7 = vpop.f32.mrb[74].mxu1 }
 0x302   :  { %v1417_v44 = vadd.f32 %v3246_v62, %v1416_v7  ;;  %v1418_v45 = vpop.f32.mrb[75].mxu1  ;;  %v1544_v55 = vmax.f32 %v1414_v53, 0.0 }
 0x304   :  { %v1545_v11 = vmax.f32 %v1417_v44, 0.0 }
 0x306   :  { %v2078_v2 = vpack.c.bf16 %v1545_v11, %v1544_v55 }
 0x307   :  { %v1421_v60 = vpop.f32.mrb[76].mxu1 }
 0x308   :  { %2154 = vst [vmem:[%s3372_s4 + $0x50] sm:$0xff] %v2078_v2   ;;  %v1422_v13 = vadd.f32 %v3246_v62, %v1421_v60  ;;  %v1423_v22 = vpop.f32.mrb[77].mxu1 }
 0x309   :  { %v1424_v35 = vpop.f32.mrb[78].mxu1 }
 0x30a   :  { %v1425_v52 = vadd.f32 %v3246_v62, %v1424_v35  ;;  %v1426_v32 = vpop.f32.mrb[79].mxu1  ;;  %v1546_v0 = vmax.f32 %v1422_v13, 0.0 }
 0x30c   :  { %v1547_v9 = vmax.f32 %v1425_v52, 0.0 }
 0x30e   :  { %v2083_v17 = vpack.c.bf16 %v1547_v9, %v1546_v0 }
 0x30f   :  { %v1429_v27 = vpop.f32.mrb[80].mxu1 }
 0x310   :  { %2155 = vst [vmem:[%s3372_s4 + $0x58] sm:$0xff] %v2083_v17   ;;  %v1430_v33 = vadd.f32 %v3246_v62, %v1429_v27  ;;  %v1431_v1 = vpop.f32.mrb[81].mxu1 }
 0x311   :  { %v1432_v40 = vpop.f32.mrb[82].mxu1 }
 0x312   :  { %v1433_v21 = vadd.f32 %v3246_v62, %v1432_v40  ;;  %v1434_v31 = vpop.f32.mrb[83].mxu1  ;;  %v1548_v39 = vmax.f32 %v1430_v33, 0.0 }
 0x314   :  { %v1549_v38 = vmax.f32 %v1433_v21, 0.0 }
 0x316   :  { %v2088_v34 = vpack.c.bf16 %v1549_v38, %v1548_v39 }
 0x317   :  { %v1437_v49 = vpop.f32.mrb[84].mxu1 }
 0x318   :  { %2156 = vst [vmem:[%s3372_s4 + $0x60] sm:$0xff] %v2088_v34   ;;  %v1438_v36 = vadd.f32 %v3246_v62, %v1437_v49  ;;  %v1439_v48 = vpop.f32.mrb[85].mxu1 }
 0x319   :  { %v1440_v12 = vpop.f32.mrb[86].mxu1 }
 0x31a   :  { %v1441_v59 = vadd.f32 %v3246_v62, %v1440_v12  ;;  %v1442_v43 = vpop.f32.mrb[87].mxu1  ;;  %v1550_v58 = vmax.f32 %v1438_v36, 0.0 }
 0x31c   :  { %v1551_v19 = vmax.f32 %v1441_v59, 0.0 }
 0x31e   :  { %v2093_v6 = vpack.c.bf16 %v1551_v19, %v1550_v58 }
 0x31f   :  { %v1445_v5 = vpop.f32.mrb[88].mxu1 }
 0x320   :  { %2157 = vst [vmem:[%s3372_s4 + $0x68] sm:$0xff] %v2093_v6   ;;  %v1446_v37 = vadd.f32 %v3246_v62, %v1445_v5  ;;  %v1447_v16 = vpop.f32.mrb[89].mxu1 }
 0x321   :  { %v1448_v47 = vpop.f32.mrb[90].mxu1 }
 0x322   :  { %v1449_v15 = vadd.f32 %v3246_v62, %v1448_v47  ;;  %v1450_v26 = vpop.f32.mrb[91].mxu1  ;;  %v1552_v8 = vmax.f32 %v1446_v37, 0.0 }
 0x324   :  { %v1553_v29 = vmax.f32 %v1449_v15, 0.0 }
 0x326   :  { %v2098_v23 = vpack.c.bf16 %v1553_v29, %v1552_v8 }
 0x327   :  { %v1453_v61 = vpop.f32.mrb[92].mxu1 }
 0x328   :  { %2158 = vst [vmem:[%s3372_s4 + $0x70] sm:$0xff] %v2098_v23   ;;  %v1454_v46 = vadd.f32 %v3246_v62, %v1453_v61  ;;  %v1455_v25 = vpop.f32.mrb[93].mxu1 }
 0x329   :  { %v1456_v56 = vpop.f32.mrb[94].mxu1 }
 0x32a   :  { %v1457_v42 = vadd.f32 %v3246_v62, %v1456_v56  ;;  %v1458_v10 = vpop.f32.mrb[95].mxu1  ;;  %v1554_v4 = vmax.f32 %v1454_v46, 0.0 }
 0x32c   :  { %v1555_v63 = vmax.f32 %v1457_v42, 0.0 }
 0x32e   :  { %v2103_v54 = vpack.c.bf16 %v1555_v63, %v1554_v4 }
 0x32f   :  { %v1461_v24 = vpop.f32.mrb[96].mxu1 }
 0x330   :  { %2159 = vst [vmem:[%s3372_s4 + $0x78] sm:$0xff] %v2103_v54   ;;  %v1462_v50 = vadd.f32 %v3246_v62, %v1461_v24  ;;  %v1463_v28 = vpop.f32.mrb[97].mxu1 }
 0x331   :  { %v1464_v14 = vpop.f32.mrb[98].mxu1 }
 0x332   :  { %v1465_v51 = vadd.f32 %v3246_v62, %v1464_v14  ;;  %v1466_v18 = vpop.f32.mrb[99].mxu1  ;;  %v1556_v41 = vmax.f32 %v1462_v50, 0.0 }
 0x334   :  { %v1557_v30 = vmax.f32 %v1465_v51, 0.0 }
 0x336   :  { %v2108_v3 = vpack.c.bf16 %v1557_v30, %v1556_v41 }
 0x337   :  { %v1469_v20 = vpop.f32.mrb[100].mxu1 }
 0x338   :  { %2160 = vst [vmem:[%s3372_s4 + $0x80] sm:$0xff] %v2108_v3   ;;  %v1470_v53 = vadd.f32 %v3246_v62, %v1469_v20  ;;  %v1471_v57 = vpop.f32.mrb[101].mxu1 }
 0x339   :  { %v1472_v7 = vpop.f32.mrb[102].mxu1 }
 0x33a   :  { %v1473_v44 = vadd.f32 %v3246_v62, %v1472_v7  ;;  %v1474_v45 = vpop.f32.mrb[103].mxu1  ;;  %v1558_v55 = vmax.f32 %v1470_v53, 0.0 }
 0x33c   :  { %v1559_v11 = vmax.f32 %v1473_v44, 0.0 }
 0x33e   :  { %v2113_v2 = vpack.c.bf16 %v1559_v11, %v1558_v55 }
 0x33f   :  { %v1477_v60 = vpop.f32.mrb[104].mxu1 }
 0x340   :  { %2161 = vst [vmem:[%s3372_s4 + $0x88] sm:$0xff] %v2113_v2   ;;  %v1478_v13 = vadd.f32 %v3246_v62, %v1477_v60  ;;  %v1479_v22 = vpop.f32.mrb[105].mxu1 }
 0x341   :  { %v1480_v35 = vpop.f32.mrb[106].mxu1 }
 0x342   :  { %v1481_v52 = vadd.f32 %v3246_v62, %v1480_v35  ;;  %v1482_v32 = vpop.f32.mrb[107].mxu1  ;;  %v1560_v0 = vmax.f32 %v1478_v13, 0.0 }
 0x344   :  { %v1561_v9 = vmax.f32 %v1481_v52, 0.0 }
 0x346   :  { %v2118_v17 = vpack.c.bf16 %v1561_v9, %v1560_v0 }
 0x347   :  { %v1485_v27 = vpop.f32.mrb[108].mxu1 }
 0x348   :  { %2162 = vst [vmem:[%s3372_s4 + $0x90] sm:$0xff] %v2118_v17   ;;  %v1486_v33 = vadd.f32 %v3246_v62, %v1485_v27  ;;  %v1487_v1 = vpop.f32.mrb[109].mxu1 }
 0x349   :  { %v1488_v40 = vpop.f32.mrb[110].mxu1 }
 0x34a   :  { %v1489_v21 = vadd.f32 %v3246_v62, %v1488_v40  ;;  %v1490_v31 = vpop.f32.mrb[111].mxu1  ;;  %v1562_v39 = vmax.f32 %v1486_v33, 0.0 }
 0x34c   :  { %v1563_v38 = vmax.f32 %v1489_v21, 0.0 }
 0x34e   :  { %v2123_v34 = vpack.c.bf16 %v1563_v38, %v1562_v39 }
 0x34f   :  { %v1493_v49 = vpop.f32.mrb[112].mxu1 }
 0x350   :  { %2163 = vst [vmem:[%s3372_s4 + $0x98] sm:$0xff] %v2123_v34   ;;  %v1494_v36 = vadd.f32 %v3246_v62, %v1493_v49  ;;  %v1495_v48 = vpop.f32.mrb[113].mxu1 }
 0x351   :  { %v1496_v12 = vpop.f32.mrb[114].mxu1 }
 0x352   :  { %v1497_v59 = vadd.f32 %v3246_v62, %v1496_v12  ;;  %v1498_v43 = vpop.f32.mrb[115].mxu1  ;;  %v1564_v58 = vmax.f32 %v1494_v36, 0.0 }
 0x354   :  { %v1565_v19 = vmax.f32 %v1497_v59, 0.0 }
 0x356   :  { %v2128_v6 = vpack.c.bf16 %v1565_v19, %v1564_v58 }
 0x357   :  { %v1501_v5 = vpop.f32.mrb[116].mxu1 }
 0x358   :  { %2164 = vst [vmem:[%s3372_s4 + $0xa0] sm:$0xff] %v2128_v6   ;;  %v1502_v37 = vadd.f32 %v3246_v62, %v1501_v5  ;;  %v1503_v16 = vpop.f32.mrb[117].mxu1 }
 0x359   :  { %v1504_v47 = vpop.f32.mrb[118].mxu1 }
 0x35a   :  { %v1505_v15 = vadd.f32 %v3246_v62, %v1504_v47  ;;  %v1506_v26 = vpop.f32.mrb[119].mxu1  ;;  %v1566_v8 = vmax.f32 %v1502_v37, 0.0 }
 0x35c   :  { %v1567_v29 = vmax.f32 %v1505_v15, 0.0 }
 0x35e   :  { %v2133_v23 = vpack.c.bf16 %v1567_v29, %v1566_v8 }
 0x35f   :  { %v1509_v61 = vpop.f32.mrb[120].mxu1 }
 0x360   :  { %2165 = vst [vmem:[%s3372_s4 + $0xa8] sm:$0xff] %v2133_v23   ;;  %v1510_v46 = vadd.f32 %v3246_v62, %v1509_v61  ;;  %v1511_v25 = vpop.f32.mrb[121].mxu1 }
 0x361   :  { %v1512_v56 = vpop.f32.mrb[122].mxu1 }
 0x362   :  { %v1513_v42 = vadd.f32 %v3246_v62, %v1512_v56  ;;  %v1514_v10 = vpop.f32.mrb[123].mxu1  ;;  %v1568_v4 = vmax.f32 %v1510_v46, 0.0 }
 0x364   :  { %v1569_v63 = vmax.f32 %v1513_v42, 0.0 }
 0x366   :  { %v2138_v54 = vpack.c.bf16 %v1569_v63, %v1568_v4 }
 0x367   :  { %v1517_v24 = vpop.f32.mrb[124].mxu1 }
 0x368   :  { %2166 = vst [vmem:[%s3372_s4 + $0xb0] sm:$0xff] %v2138_v54   ;;  %v1518_v50 = vadd.f32 %v3246_v62, %v1517_v24  ;;  %v1519_v28 = vpop.f32.mrb[125].mxu1 }
 0x369   :  { %v1520_v14 = vpop.f32.mrb[126].mxu1 }
 0x36a   :  { %v1521_v51 = vadd.f32 %v3246_v62, %v1520_v14  ;;  %v1522_v18 = vpop.f32.mrb[127].mxu1  ;;  %v1570_v41 = vmax.f32 %v1518_v50, 0.0 }
 0x36c   :  { %v1571_v30 = vmax.f32 %v1521_v51, 0.0 }
 0x36e   :  { %v2143_v3 = vpack.c.bf16 %v1571_v30, %v1570_v41 }
 0x370   :  { %2167 = vst [vmem:[%s3372_s4 + $0xb8] sm:$0xff] %v2143_v3  }

</bundles_post_ra>
